<compile_context>
chip_gen: v7x
topology: tpu7x:2x2x1
jax: 0.10.0
libtpu: 0.0.40
codegen_flags: <defaults>
</compile_context>

<pallas_src>
import numpy as np
import jax
import jax.numpy as jnp
from jax import lax
from jax.experimental import pallas as pl
from jax.experimental.pallas import tpu as pltpu

LN_EPS = 1e-5
_INV_SQRT2 = np.float32(1.0 / np.sqrt(2.0))


def _gelu_exact(v):
    # exact (erf-based) GELU, matching nn.GELU() default
    return 0.5 * v * (1.0 + lax.erf(v * _INV_SQRT2))


def tsla_kernel(x_ref, dft_ref, idft_ref,
                ln1w, ln1b, cwr, cwi, cwhr, cwhi, thr,
                ln2w, ln2b, w1t, b1, w2p, w2m, w2n, b2, w3t, b3,
                o_ref, asb_ref):
    M, C = x_ref.shape                     # M = block_b * N rows
    two_fp, N = dft_ref.shape
    Fp = two_fp // 2                       # F padded up to a multiple of 8
    F = N // 2 + 1                         # true rfft length
    Bb = M // N                            # sequences in this block
    k_med = (F - 1) // 2                   # lower-median rank (torch.median)

    def layernorm(v, w, b):
        mu = jnp.mean(v, axis=-1, keepdims=True)
        var = jnp.mean((v - mu) ** 2, axis=-1, keepdims=True)
        return (v - mu) * lax.rsqrt(var + LN_EPS) * w + b

    dft = dft_ref[...]                     # (2Fp, N): [cos ; -sin] / sqrt(N)
    idft = idft_ref[...]                   # (N, 2Fp): [c*cos | -c*sin] / sqrt(N)
    ln1w_v, ln1b_v = ln1w[...], ln1b[...]
    wr, wi = cwr[...], cwi[...]            # (1, C)
    whr, whi = cwhr[...], cwhi[...]        # (1, C)
    thr_v = thr[...]                       # (1, 1)

    # helpers for the vectorized lower-median (hoisted out of the loop)
    iota_r = lax.broadcasted_iota(jnp.int32, (Fp, Fp), 0)
    iota_c = lax.broadcasted_iota(jnp.int32, (Fp, Fp), 1)
    eye = iota_r == iota_c
    valid_j = iota_r < F                                   # valid freqs (rows)
    valid_i = lax.broadcasted_iota(jnp.int32, (1, Fp), 1) < F

    # ------------- norm1 + Adaptive_Spectral_Block, one sequence / iter -------------
    def asb_body(b, carry):
        start = pl.multiple_of(b * N, N)
        xb = x_ref[pl.ds(start, N), :]                               # (N, C)
        xbn = layernorm(xb, ln1w_v, ln1b_v)

        # rfft (ortho): real+imag in ONE matmul (padded rows are exactly 0)
        X = jnp.dot(dft, xbn, preferred_element_type=jnp.float32)    # (2Fp, C)
        Xr = X[:Fp, :]
        Xi = X[Fp:, :]

        # spectral energy and its lower median (== torch.median), vectorized:
        # le[i] = #{valid j : e[j] <= e[i]}; median = min candidate with
        # rank >= k_med + 1  -> single (Fp,Fp) masked reduction.
        e_col = jnp.sum(Xr * Xr + Xi * Xi, axis=-1, keepdims=True)   # (Fp, 1)
        e_row = jnp.sum(jnp.where(eye, e_col, 0.0),
                        axis=0, keepdims=True)                       # (1, Fp)
        le = jnp.sum(jnp.where(valid_j & (e_col <= e_row), 1.0, 0.0),
                     axis=0, keepdims=True)                          # (1, Fp)
        cand = valid_i & (le >= (k_med + 1.0))
        med = jnp.min(jnp.where(cand, e_row, jnp.inf),
                      axis=1, keepdims=True)                         # (1, 1)

        mask = (e_col / (med + 1e-6) > thr_v).astype(jnp.float32)    # (Fp, 1)

        # fold the masked high-pass path into the complex weights
        wr_eff = wr + mask * whr                                     # (Fp, C)
        wi_eff = wi + mask * whi
        Ywr = Xr * wr_eff - Xi * wi_eff
        Ywi = Xr * wi_eff + Xi * wr_eff
        Yw = jnp.concatenate([Ywr, Ywi], axis=0)                     # (2Fp, C)

        # irfft(n=N, ortho) in ONE matmul, written straight to scratch
        asb_ref[pl.ds(start, N), :] = jnp.dot(
            idft, Yw, preferred_element_type=jnp.float32)
        return carry

    lax.fori_loop(0, Bb, asb_body, 0)

    # ------------- norm2 + ICB + residual --------------------------------
    x0 = x_ref[...]                                      # (M, C)
    y = layernorm(asb_ref[...], ln2w[...], ln2b[...])    # (M, C)

    # boundary keep-masks built in-kernel (pos = row index within sequence)
    rowf = lax.broadcasted_iota(jnp.int32, (M, 1), 0).astype(jnp.float32)
    posf = rowf - jnp.floor(rowf / float(N)) * float(N)
    keep_prev = (posf >= 0.5).astype(jnp.float32)              # pos != 0
    keep_next = (posf <= float(N) - 1.5).astype(jnp.float32)   # pos != N-1

    # sequence shifts with zero padding; wrapped rows at each per-sequence
    # boundary are killed by the keep-masks.
    zrow = jnp.zeros((1, C), jnp.float32)
    y_prev = jnp.concatenate([zrow, y[:-1, :]], axis=0) * keep_prev   # y[n-1]
    y_next = jnp.concatenate([y[1:, :], zrow], axis=0) * keep_next    # y[n+1]

    bf = jnp.bfloat16
    y16 = y.astype(bf)
    # conv1 (1x1): bf16 operands, f32 accumulation
    x1 = jnp.dot(y16, w1t[...], preferred_element_type=jnp.float32) + b1[...]
    # conv2 (k=3, pad=1): three accumulating (M,C)@(C,H) dots (no (M,3C) concat)
    x2 = jnp.dot(y_prev.astype(bf), w2p[...], preferred_element_type=jnp.float32)
    x2 = x2 + jnp.dot(y16, w2m[...], preferred_element_type=jnp.float32)
    x2 = x2 + jnp.dot(y_next.astype(bf), w2n[...], preferred_element_type=jnp.float32)
    x2 = x2 + b2[...]

    x1a = _gelu_exact(x1)
    x2a = _gelu_exact(x2)
    out = x1 * x2a + x2 * x1a                            # drop = 0 -> identity
    # conv3 (1x1)
    z = jnp.dot(out.astype(bf), w3t[...], preferred_element_type=jnp.float32) + b3[...]

    # ------------- residual -----------------------------------------------
    o_ref[...] = (x0 + z).astype(o_ref.dtype)


def _pick_vmem_limit():
    try:
        kind = jax.devices()[0].device_kind.lower()
    except Exception:
        kind = ""
    if "v7" in kind:
        return 40 * 1024 * 1024        # v7x: 64 MiB physical -> leave headroom
    return 64 * 1024 * 1024            # v5e / v6e: 128 MiB physical


def _pick_block_b(B, N, C, H, vmem_limit):
    # rough f32 peak live bytes per block row: C-wide (x in/out double buffers,
    # asb scratch, y, y_prev, y_next) + H-wide (x1, x2, gelu temporaries, out)
    per_row = 4 * (8 * C + 6 * H)
    budget = vmem_limit // 2
    best = 1
    for d in range(1, B + 1):
        if B % d == 0 and d * N * per_row <= budget:
            best = d
    if B >= 2:
        # keep >= 2 grid steps so the "parallel" axis feeds both v7x TCs
        best = min(best, B // 2)
        while B % best:
            best -= 1
    return max(best, 1)


def tslanet_layer(x, params, consts, block_b=None):
    B, N, C = x.shape
    H = params["b1"].shape[-1]
    vmem_limit = _pick_vmem_limit()
    if block_b is None:
        block_b = _pick_block_b(B, N, C, H, vmem_limit)
    assert B % block_b == 0
    M = block_b * N                     # N % 8 == 0 keeps per-sequence slices aligned

    bf = jnp.bfloat16
    ordered = [consts["dft"], consts["idft"],
               params["ln1_w"], params["ln1_b"],
               params["cw_r"], params["cw_i"], params["cwh_r"], params["cwh_i"],
               params["thr"],
               params["ln2_w"], params["ln2_b"],
               params["w1t"].astype(bf), params["b1"],
               params["w2p"].astype(bf), params["w2m"].astype(bf),
               params["w2n"].astype(bf), params["b2"],
               params["w3t"].astype(bf), params["b3"]]

    def cspec(shape):
        nd = len(shape)
        return pl.BlockSpec(shape, lambda *_: (0,) * nd)

    in_specs = [pl.BlockSpec((M, C), lambda i: (i, 0))]
    in_specs += [cspec(tuple(a.shape)) for a in ordered]

    out_flat = pl.pallas_call(
        tsla_kernel,
        out_shape=jax.ShapeDtypeStruct((B * N, C), jnp.float32),
        grid_spec=pltpu.PrefetchScalarGridSpec(
            num_scalar_prefetch=0,
            grid=(B // block_b,),
            in_specs=in_specs,
            out_specs=pl.BlockSpec((M, C), lambda i: (i, 0)),
            scratch_shapes=[pltpu.VMEM((M, C), jnp.float32)],
        ),
        compiler_params=pltpu.CompilerParams(
            dimension_semantics=("parallel",),
            vmem_limit_bytes=vmem_limit),
    )(x.reshape(B * N, C), *ordered)
    return out_flat.reshape(B, N, C)


def make_consts(N):
    # rfft/irfft (norm='ortho') as dense DFT matrices, cos/sin pre-stacked so
    # each direction is a single matmul; F is padded to a multiple of 8 so the
    # real/imag split stays sublane-aligned (padded rows/cols are zero).
    F = N // 2 + 1
    Fp = ((F + 7) // 8) * 8
    n = np.arange(N)
    f = np.arange(F)
    scale = 1.0 / np.sqrt(N)
    ang = 2.0 * np.pi * np.outer(f, n) / N                 # (F, N)
    dft = np.zeros((2 * Fp, N), np.float32)
    dft[:F] = np.cos(ang) * scale                          # rfft real part
    dft[Fp:Fp + F] = -np.sin(ang) * scale                  # rfft imag part
    coeff = np.full((F,), 2.0)
    coeff[0] = 1.0
    if N % 2 == 0:
        coeff[-1] = 1.0
    ang2 = 2.0 * np.pi * np.outer(n, f) / N                # (N, F)
    idft = np.zeros((N, 2 * Fp), np.float32)
    idft[:, :F] = coeff[None, :] * np.cos(ang2) * scale    # irfft from real part
    idft[:, Fp:Fp + F] = -coeff[None, :] * np.sin(ang2) * scale  # from imag part
    return dict(dft=jnp.asarray(dft), idft=jnp.asarray(idft))


def init_params(key, dim, mlp_ratio=3.0):
    C = dim
    H = int(dim * mlp_ratio)
    ks = jax.random.split(key, 6)

    def trunc(k, shape, std=0.02):
        return jax.random.truncated_normal(k, -2.0, 2.0, shape, jnp.float32) * std

    cw = trunc(ks[0], (C, 2))                       # complex_weight
    cwh = trunc(ks[1], (C, 2))                      # complex_weight_high
    thr = jax.random.uniform(ks[2], (1, 1), jnp.float32)   # threshold_param ~ U[0,1)

    def conv_init(k, out_c, in_c, ksize):           # PyTorch Conv1d default init
        bound = 1.0 / np.sqrt(in_c * ksize)
        kw, kb = jax.random.split(k)
        w = jax.random.uniform(kw, (out_c, in_c, ksize), jnp.float32, -bound, bound)
        b = jax.random.uniform(kb, (out_c,), jnp.float32, -bound, bound)
        return w, b

    w1, b1 = conv_init(ks[3], H, C, 1)
    w2, b2 = conv_init(ks[4], H, C, 3)
    w3, b3 = conv_init(ks[5], C, H, 1)

    return dict(
        ln1_w=jnp.ones((1, C), jnp.float32), ln1_b=jnp.zeros((1, C), jnp.float32),
        ln2_w=jnp.ones((1, C), jnp.float32), ln2_b=jnp.zeros((1, C), jnp.float32),
        cw_r=cw[:, 0].reshape(1, C), cw_i=cw[:, 1].reshape(1, C),
        cwh_r=cwh[:, 0].reshape(1, C), cwh_i=cwh[:, 1].reshape(1, C),
        thr=thr,
        w1t=jnp.transpose(w1[:, :, 0]),             # (C, H)
        b1=b1.reshape(1, H),
        w2p=jnp.transpose(w2[:, :, 0]),             # (C, H) tap for y[n-1]
        w2m=jnp.transpose(w2[:, :, 1]),             # (C, H) tap for y[n]
        w2n=jnp.transpose(w2[:, :, 2]),             # (C, H) tap for y[n+1]
        b2=b2.reshape(1, H),
        w3t=jnp.transpose(w3[:, :, 0]),             # (H, C)
        b3=b3.reshape(1, C),
    )


def reference(x, params, N):
    # pure-JAX f32 reference of the PyTorch forward (drop/drop_path = 0)
    def ln(v, w, b):
        mu = v.mean(-1, keepdims=True)
        var = ((v - mu) ** 2).mean(-1, keepdims=True)
        return (v - mu) / jnp.sqrt(var + LN_EPS) * w[0] + b[0]

    xn = ln(x, params["ln1_w"], params["ln1_b"])
    xf = jnp.fft.rfft(xn, axis=1, norm="ortho")
    w = params["cw_r"][0] + 1j * params["cw_i"][0]
    xw = xf * w
    energy = jnp.sum(jnp.abs(xf) ** 2, axis=-1)
    med = jnp.median(energy, axis=1, keepdims=True)   # F is odd here -> matches torch
    mask = (energy / (med + 1e-6) > params["thr"][0, 0]).astype(jnp.float32)[..., None]
    wh = params["cwh_r"][0] + 1j * params["cwh_i"][0]
    xw = xw + (xf * mask) * wh
    xa = jnp.fft.irfft(xw, n=N, axis=1, norm="ortho")
    y = ln(xa, params["ln2_w"], params["ln2_b"])
    x1 = y @ params["w1t"] + params["b1"]
    yp = jnp.pad(y, ((0, 0), (1, 1), (0, 0)))
    x2 = (yp[:, :-2] @ params["w2p"] + yp[:, 1:-1] @ params["w2m"] +
          yp[:, 2:] @ params["w2n"] + params["b2"])
    g = lambda v: jax.nn.gelu(v, approximate=False)
    out = x1 * g(x2) + x2 * g(x1)
    z = out @ params["w3t"] + params["b3"]
    return x + z


if __name__ == "__main__":
    B, N, C = 2, 8, 16          # batch, sequence length, dim ; hidden = 3*dim = 48
    key = jax.random.PRNGKey(0)
    kx, kp = jax.random.split(key)
    x = jax.random.normal(kx, (B, N, C), jnp.float32)
    params = init_params(kp, C, mlp_ratio=3.0)
    consts = make_consts(N)

    out = tslanet_layer(x, params, consts)
    out = jax.block_until_ready(out)

    ref = reference(x, params, N)
    assert out.shape == (B, N, C)
    # ICB matmuls use bf16 MXU operands (f32 accumulation) -> looser tolerance
    # than a pure-f32 comparison; spectral path / mask decisions stay f32-exact.
    assert jnp.allclose(out, ref, rtol=3e-2, atol=3e-2), \
        float(jnp.max(jnp.abs(out - ref)))
    print("KERNEL_OK")
</pallas_src>

<mosaic_0001>
module attributes {stable_mosaic.version = 11 : i64} {
  func.func @tsla_kernel(%arg0: i32, %arg1: memref<8x16xf32, #tpu.memory_space<vmem>>, %arg2: memref<16x8xf32, #tpu.memory_space<vmem>>, %arg3: memref<8x16xf32, #tpu.memory_space<vmem>>, %arg4: memref<1x16xf32, #tpu.memory_space<vmem>>, %arg5: memref<1x16xf32, #tpu.memory_space<vmem>>, %arg6: memref<1x16xf32, #tpu.memory_space<vmem>>, %arg7: memref<1x16xf32, #tpu.memory_space<vmem>>, %arg8: memref<1x16xf32, #tpu.memory_space<vmem>>, %arg9: memref<1x16xf32, #tpu.memory_space<vmem>>, %arg10: memref<1x1xf32, #tpu.memory_space<vmem>>, %arg11: memref<1x16xf32, #tpu.memory_space<vmem>>, %arg12: memref<1x16xf32, #tpu.memory_space<vmem>>, %arg13: memref<16x48xbf16, #tpu.memory_space<vmem>>, %arg14: memref<1x48xf32, #tpu.memory_space<vmem>>, %arg15: memref<16x48xbf16, #tpu.memory_space<vmem>>, %arg16: memref<16x48xbf16, #tpu.memory_space<vmem>>, %arg17: memref<16x48xbf16, #tpu.memory_space<vmem>>, %arg18: memref<1x48xf32, #tpu.memory_space<vmem>>, %arg19: memref<48x16xbf16, #tpu.memory_space<vmem>>, %arg20: memref<1x16xf32, #tpu.memory_space<vmem>>, %arg21: memref<8x16xf32, #tpu.memory_space<vmem>>, %arg22: memref<8x16xf32, #tpu.memory_space<vmem>>) attributes {dimension_semantics = [#tpu.dimension_semantics<parallel>], iteration_bounds = array<i64: 2>, scalar_prefetch = 0 : i64, scratch_operands = 1 : i64, tpu.core_type = #tpu.core_type<tc>, window_params = [{transform_indices = @transform_0, window_bounds = array<i64: 8, 16>}, {pipeline_mode = #tpu.pipeline_mode<synchronous>, transform_indices = @transform_1, window_bounds = array<i64: 16, 8>}, {pipeline_mode = #tpu.pipeline_mode<synchronous>, transform_indices = @transform_2, window_bounds = array<i64: 8, 16>}, {pipeline_mode = #tpu.pipeline_mode<synchronous>, transform_indices = @transform_3, window_bounds = array<i64: 1, 16>}, {pipeline_mode = #tpu.pipeline_mode<synchronous>, transform_indices = @transform_4, window_bounds = array<i64: 1, 16>}, {pipeline_mode = #tpu.pipeline_mode<synchronous>, transform_indices = @transform_5, window_bounds = array<i64: 1, 16>}, {pipeline_mode = #tpu.pipeline_mode<synchronous>, transform_indices = @transform_6, window_bounds = array<i64: 1, 16>}, {pipeline_mode = #tpu.pipeline_mode<synchronous>, transform_indices = @transform_7, window_bounds = array<i64: 1, 16>}, {pipeline_mode = #tpu.pipeline_mode<synchronous>, transform_indices = @transform_8, window_bounds = array<i64: 1, 16>}, {pipeline_mode = #tpu.pipeline_mode<synchronous>, transform_indices = @transform_9, window_bounds = array<i64: 1, 1>}, {pipeline_mode = #tpu.pipeline_mode<synchronous>, transform_indices = @transform_10, window_bounds = array<i64: 1, 16>}, {pipeline_mode = #tpu.pipeline_mode<synchronous>, transform_indices = @transform_11, window_bounds = array<i64: 1, 16>}, {pipeline_mode = #tpu.pipeline_mode<synchronous>, transform_indices = @transform_12, window_bounds = array<i64: 16, 48>}, {pipeline_mode = #tpu.pipeline_mode<synchronous>, transform_indices = @transform_13, window_bounds = array<i64: 1, 48>}, {pipeline_mode = #tpu.pipeline_mode<synchronous>, transform_indices = @transform_14, window_bounds = array<i64: 16, 48>}, {pipeline_mode = #tpu.pipeline_mode<synchronous>, transform_indices = @transform_15, window_bounds = array<i64: 16, 48>}, {pipeline_mode = #tpu.pipeline_mode<synchronous>, transform_indices = @transform_16, window_bounds = array<i64: 16, 48>}, {pipeline_mode = #tpu.pipeline_mode<synchronous>, transform_indices = @transform_17, window_bounds = array<i64: 1, 48>}, {pipeline_mode = #tpu.pipeline_mode<synchronous>, transform_indices = @transform_18, window_bounds = array<i64: 48, 16>}, {pipeline_mode = #tpu.pipeline_mode<synchronous>, transform_indices = @transform_19, window_bounds = array<i64: 1, 16>}, {transform_indices = @transform_20, window_bounds = array<i64: 8, 16>}]} {
    %c0 = arith.constant 0 : index
    %c0_0 = arith.constant 0 : index
    %0 = vector.load %arg2[%c0, %c0_0] : memref<16x8xf32, #tpu.memory_space<vmem>>, vector<16x8xf32>
    %c0_1 = arith.constant 0 : index
    %c0_2 = arith.constant 0 : index
    %1 = vector.load %arg3[%c0_1, %c0_2] : memref<8x16xf32, #tpu.memory_space<vmem>>, vector<8x16xf32>
    %c0_3 = arith.constant 0 : index
    %c0_4 = arith.constant 0 : index
    %2 = vector.load %arg4[%c0_3, %c0_4] : memref<1x16xf32, #tpu.memory_space<vmem>>, vector<1x16xf32>
    %c0_5 = arith.constant 0 : index
    %c0_6 = arith.constant 0 : index
    %3 = vector.load %arg5[%c0_5, %c0_6] : memref<1x16xf32, #tpu.memory_space<vmem>>, vector<1x16xf32>
    %c0_7 = arith.constant 0 : index
    %c0_8 = arith.constant 0 : index
    %4 = vector.load %arg6[%c0_7, %c0_8] : memref<1x16xf32, #tpu.memory_space<vmem>>, vector<1x16xf32>
    %c0_9 = arith.constant 0 : index
    %c0_10 = arith.constant 0 : index
    %5 = vector.load %arg7[%c0_9, %c0_10] : memref<1x16xf32, #tpu.memory_space<vmem>>, vector<1x16xf32>
    %c0_11 = arith.constant 0 : index
    %c0_12 = arith.constant 0 : index
    %6 = vector.load %arg8[%c0_11, %c0_12] : memref<1x16xf32, #tpu.memory_space<vmem>>, vector<1x16xf32>
    %c0_13 = arith.constant 0 : index
    %c0_14 = arith.constant 0 : index
    %7 = vector.load %arg9[%c0_13, %c0_14] : memref<1x16xf32, #tpu.memory_space<vmem>>, vector<1x16xf32>
    %c0_15 = arith.constant 0 : index
    %c0_16 = arith.constant 0 : index
    %8 = vector.load %arg10[%c0_15, %c0_16] : memref<1x1xf32, #tpu.memory_space<vmem>>, vector<1x1xf32>
    %9 = tpu.iota {dimensions = array<i32: 0>} : vector<8x8xi32>
    %10 = tpu.iota {dimensions = array<i32: 1>} : vector<8x8xi32>
    %11 = arith.cmpi eq, %9, %10 : vector<8x8xi32>
    %c5_i32 = arith.constant 5 : i32
    %12 = vector.broadcast %c5_i32 : i32 to vector<8x8xi32>
    %13 = arith.cmpi slt, %9, %12 : vector<8x8xi32>
    %14 = tpu.iota {dimensions = array<i32: 1>} : vector<1x8xi32>
    %c5_i32_17 = arith.constant 5 : i32
    %15 = vector.broadcast %c5_i32_17 : i32 to vector<1x8xi32>
    %16 = arith.cmpi slt, %14, %15 : vector<1x8xi32>
    %c0_i32 = arith.constant 0 : i32
    %c8_i32 = arith.constant 8 : i32
    %17 = arith.muli %c0_i32, %c8_i32 : i32
    %18 = tpu.assume_multiple %17, 8 : i32
    %19 = arith.index_cast %18 : i32 to index
    %c0_18 = arith.constant 0 : index
    %20 = vector.load %arg1[%19, %c0_18] : memref<8x16xf32, #tpu.memory_space<vmem>>, vector<8x16xf32>
    %cst = arith.constant dense<0.000000e+00> : vector<8xf32>
    %21 = vector.multi_reduction <add>, %20, %cst [1] : vector<8x16xf32> to vector<8xf32>
    %22 = vector.shape_cast %21 : vector<8xf32> to vector<8x1xf32>
    %cst_19 = arith.constant 1.600000e+01 : f32
    %23 = vector.broadcast %cst_19 : f32 to vector<8x1xf32>
    %24 = arith.divf %22, %23 : vector<8x1xf32>
    %25 = vector.broadcast %24 : vector<8x1xf32> to vector<8x16xf32>
    %26 = arith.subf %20, %25 : vector<8x16xf32>
    %27 = arith.mulf %26, %26 : vector<8x16xf32>
    %cst_20 = arith.constant dense<0.000000e+00> : vector<8xf32>
    %28 = vector.multi_reduction <add>, %27, %cst_20 [1] : vector<8x16xf32> to vector<8xf32>
    %29 = vector.shape_cast %28 : vector<8xf32> to vector<8x1xf32>
    %cst_21 = arith.constant 1.600000e+01 : f32
    %30 = vector.broadcast %cst_21 : f32 to vector<8x1xf32>
    %31 = arith.divf %29, %30 : vector<8x1xf32>
    %32 = vector.broadcast %24 : vector<8x1xf32> to vector<8x16xf32>
    %33 = arith.subf %20, %32 : vector<8x16xf32>
    %cst_22 = arith.constant 9.99999974E-6 : f32
    %34 = vector.broadcast %cst_22 : f32 to vector<8x1xf32>
    %35 = arith.addf %31, %34 : vector<8x1xf32>
    %36 = math.rsqrt %35 : vector<8x1xf32>
    %37 = vector.broadcast %36 : vector<8x1xf32> to vector<8x16xf32>
    %38 = arith.mulf %33, %37 : vector<8x16xf32>
    %39 = vector.broadcast %2 : vector<1x16xf32> to vector<8x16xf32>
    %40 = arith.mulf %38, %39 : vector<8x16xf32>
    %41 = vector.broadcast %3 : vector<1x16xf32> to vector<8x16xf32>
    %42 = arith.addf %40, %41 : vector<8x16xf32>
    %cst_23 = arith.constant dense<0.000000e+00> : vector<16x16xf32>
    %43 = tpu.matmul %0, %42, %cst_23 {dimension_numbers = #tpu.dot_dimension_numbers<[1], [0], [0], [1], [0, 0, 1, 1], [], []>} : vector<16x8xf32>, vector<8x16xf32>, vector<16x16xf32> -> vector<16x16xf32>
    %44 = vector.extract_strided_slice %43 {offsets = [0, 0], sizes = [8, 16], strides = [1, 1]} : vector<16x16xf32> to vector<8x16xf32>
    %45 = vector.extract_strided_slice %43 {offsets = [8, 0], sizes = [8, 16], strides = [1, 1]} : vector<16x16xf32> to vector<8x16xf32>
    %46 = arith.mulf %44, %44 : vector<8x16xf32>
    %47 = arith.mulf %45, %45 : vector<8x16xf32>
    %48 = arith.addf %46, %47 : vector<8x16xf32>
    %cst_24 = arith.constant dense<0.000000e+00> : vector<8xf32>
    %49 = vector.multi_reduction <add>, %48, %cst_24 [1] : vector<8x16xf32> to vector<8xf32>
    %50 = vector.shape_cast %49 : vector<8xf32> to vector<8x1xf32>
    %cst_25 = arith.constant 0.000000e+00 : f32
    %51 = vector.shape_cast %50 : vector<8x1xf32> to vector<8x1xf32>
    %52 = vector.broadcast %51 : vector<8x1xf32> to vector<8x8xf32>
    %53 = vector.broadcast %cst_25 : f32 to vector<8x8xf32>
    %54 = arith.select %11, %52, %53 : vector<8x8xi1>, vector<8x8xf32>
    %cst_26 = arith.constant dense<0.000000e+00> : vector<8xf32>
    %55 = vector.multi_reduction <add>, %54, %cst_26 [0] : vector<8x8xf32> to vector<8xf32>
    %56 = vector.shape_cast %55 : vector<8xf32> to vector<1x8xf32>
    %57 = vector.broadcast %50 : vector<8x1xf32> to vector<8x8xf32>
    %58 = vector.broadcast %56 : vector<1x8xf32> to vector<8x8xf32>
    %59 = arith.cmpf ole, %57, %58 : vector<8x8xf32>
    %60 = arith.andi %13, %59 : vector<8x8xi1>
    %cst_27 = arith.constant 1.000000e+00 : f32
    %cst_28 = arith.constant 0.000000e+00 : f32
    %61 = vector.broadcast %cst_27 : f32 to vector<8x8xf32>
    %62 = vector.broadcast %cst_28 : f32 to vector<8x8xf32>
    %63 = arith.select %60, %61, %62 : vector<8x8xi1>, vector<8x8xf32>
    %cst_29 = arith.constant dense<0.000000e+00> : vector<8xf32>
    %64 = vector.multi_reduction <add>, %63, %cst_29 [0] : vector<8x8xf32> to vector<8xf32>
    %65 = vector.shape_cast %64 : vector<8xf32> to vector<1x8xf32>
    %cst_30 = arith.constant 3.000000e+00 : f32
    %66 = vector.broadcast %cst_30 : f32 to vector<1x8xf32>
    %67 = arith.cmpf oge, %65, %66 : vector<1x8xf32>
    %68 = arith.andi %16, %67 : vector<1x8xi1>
    %cst_31 = arith.constant 0x7F800000 : f32
    %69 = vector.broadcast %cst_31 : f32 to vector<1x8xf32>
    %70 = arith.select %68, %56, %69 : vector<1x8xi1>, vector<1x8xf32>
    %cst_32 = arith.constant dense<0x7F800000> : vector<1xf32>
    %71 = vector.multi_reduction <minimumf>, %70, %cst_32 [1] : vector<1x8xf32> to vector<1xf32>
    %72 = vector.shape_cast %71 : vector<1xf32> to vector<1x1xf32>
    %cst_33 = arith.constant 9.99999997E-7 : f32
    %73 = vector.broadcast %cst_33 : f32 to vector<1x1xf32>
    %74 = arith.addf %72, %73 : vector<1x1xf32>
    %75 = vector.broadcast %74 : vector<1x1xf32> to vector<8x1xf32>
    %76 = arith.divf %50, %75 : vector<8x1xf32>
    %77 = vector.broadcast %8 : vector<1x1xf32> to vector<8x1xf32>
    %78 = arith.cmpf ogt, %76, %77 : vector<8x1xf32>
    %79 = arith.extui %78 : vector<8x1xi1> to vector<8x1xi32>
    %80 = arith.sitofp %79 : vector<8x1xi32> to vector<8x1xf32>
    %81 = vector.broadcast %80 : vector<8x1xf32> to vector<8x16xf32>
    %82 = vector.broadcast %6 : vector<1x16xf32> to vector<8x16xf32>
    %83 = arith.mulf %81, %82 : vector<8x16xf32>
    %84 = vector.broadcast %4 : vector<1x16xf32> to vector<8x16xf32>
    %85 = arith.addf %84, %83 : vector<8x16xf32>
    %86 = vector.broadcast %80 : vector<8x1xf32> to vector<8x16xf32>
    %87 = vector.broadcast %7 : vector<1x16xf32> to vector<8x16xf32>
    %88 = arith.mulf %86, %87 : vector<8x16xf32>
    %89 = vector.broadcast %5 : vector<1x16xf32> to vector<8x16xf32>
    %90 = arith.addf %89, %88 : vector<8x16xf32>
    %91 = arith.mulf %44, %85 : vector<8x16xf32>
    %92 = arith.mulf %45, %90 : vector<8x16xf32>
    %93 = arith.subf %91, %92 : vector<8x16xf32>
    %94 = arith.mulf %44, %90 : vector<8x16xf32>
    %95 = arith.mulf %45, %85 : vector<8x16xf32>
    %96 = arith.addf %94, %95 : vector<8x16xf32>
    %97 = tpu.concatenate %93, %96 in 0 : vector<8x16xf32>, vector<8x16xf32> -> vector<16x16xf32>
    %cst_34 = arith.constant dense<0.000000e+00> : vector<8x16xf32>
    %98 = tpu.matmul %1, %97, %cst_34 {dimension_numbers = #tpu.dot_dimension_numbers<[1], [0], [0], [1], [0, 0, 1, 1], [], []>} : vector<8x16xf32>, vector<16x16xf32>, vector<8x16xf32> -> vector<8x16xf32>
    %99 = arith.index_cast %18 : i32 to index
    %c0_35 = arith.constant 0 : index
    %100 = vector.load %arg22[%99, %c0_35] : memref<8x16xf32, #tpu.memory_space<vmem>>, vector<8x16xf32>
    tpu.vector_store %arg22[%99, %c0_35], %98 {strides = array<i32>} : memref<8x16xf32, #tpu.memory_space<vmem>>, vector<8x16xf32>,
    %c1_i32 = arith.constant 1 : i32
    %c0_36 = arith.constant 0 : index
    %c0_37 = arith.constant 0 : index
    %101 = vector.load %arg1[%c0_36, %c0_37] : memref<8x16xf32, #tpu.memory_space<vmem>>, vector<8x16xf32>
    %c0_38 = arith.constant 0 : index
    %c0_39 = arith.constant 0 : index
    %102 = vector.load %arg22[%c0_38, %c0_39] : memref<8x16xf32, #tpu.memory_space<vmem>>, vector<8x16xf32>
    %c0_40 = arith.constant 0 : index
    %c0_41 = arith.constant 0 : index
    %103 = vector.load %arg11[%c0_40, %c0_41] : memref<1x16xf32, #tpu.memory_space<vmem>>, vector<1x16xf32>
    %c0_42 = arith.constant 0 : index
    %c0_43 = arith.constant 0 : index
    %104 = vector.load %arg12[%c0_42, %c0_43] : memref<1x16xf32, #tpu.memory_space<vmem>>, vector<1x16xf32>
    %cst_44 = arith.constant dense<0.000000e+00> : vector<8xf32>
    %105 = vector.multi_reduction <add>, %102, %cst_44 [1] : vector<8x16xf32> to vector<8xf32>
    %106 = vector.shape_cast %105 : vector<8xf32> to vector<8x1xf32>
    %cst_45 = arith.constant 1.600000e+01 : f32
    %107 = vector.broadcast %cst_45 : f32 to vector<8x1xf32>
    %108 = arith.divf %106, %107 : vector<8x1xf32>
    %109 = vector.broadcast %108 : vector<8x1xf32> to vector<8x16xf32>
    %110 = arith.subf %102, %109 : vector<8x16xf32>
    %111 = arith.mulf %110, %110 : vector<8x16xf32>
    %cst_46 = arith.constant dense<0.000000e+00> : vector<8xf32>
    %112 = vector.multi_reduction <add>, %111, %cst_46 [1] : vector<8x16xf32> to vector<8xf32>
    %113 = vector.shape_cast %112 : vector<8xf32> to vector<8x1xf32>
    %cst_47 = arith.constant 1.600000e+01 : f32
    %114 = vector.broadcast %cst_47 : f32 to vector<8x1xf32>
    %115 = arith.divf %113, %114 : vector<8x1xf32>
    %116 = vector.broadcast %108 : vector<8x1xf32> to vector<8x16xf32>
    %117 = arith.subf %102, %116 : vector<8x16xf32>
    %cst_48 = arith.constant 9.99999974E-6 : f32
    %118 = vector.broadcast %cst_48 : f32 to vector<8x1xf32>
    %119 = arith.addf %115, %118 : vector<8x1xf32>
    %120 = math.rsqrt %119 : vector<8x1xf32>
    %121 = vector.broadcast %120 : vector<8x1xf32> to vector<8x16xf32>
    %122 = arith.mulf %117, %121 : vector<8x16xf32>
    %123 = vector.broadcast %103 : vector<1x16xf32> to vector<8x16xf32>
    %124 = arith.mulf %122, %123 : vector<8x16xf32>
    %125 = vector.broadcast %104 : vector<1x16xf32> to vector<8x16xf32>
    %126 = arith.addf %124, %125 : vector<8x16xf32>
    %127 = tpu.iota {dimensions = array<i32: 0>} : vector<8x1xi32>
    %128 = arith.sitofp %127 : vector<8x1xi32> to vector<8x1xf32>
    %cst_49 = arith.constant 8.000000e+00 : f32
    %129 = vector.broadcast %cst_49 : f32 to vector<8x1xf32>
    %130 = arith.divf %128, %129 : vector<8x1xf32>
    %131 = math.floor %130 : vector<8x1xf32>
    %cst_50 = arith.constant 8.000000e+00 : f32
    %132 = vector.broadcast %cst_50 : f32 to vector<8x1xf32>
    %133 = arith.mulf %131, %132 : vector<8x1xf32>
    %134 = arith.subf %128, %133 : vector<8x1xf32>
    %cst_51 = arith.constant 5.000000e-01 : f32
    %135 = vector.broadcast %cst_51 : f32 to vector<8x1xf32>
    %136 = arith.cmpf oge, %134, %135 : vector<8x1xf32>
    %137 = arith.extui %136 : vector<8x1xi1> to vector<8x1xi32>
    %138 = arith.sitofp %137 : vector<8x1xi32> to vector<8x1xf32>
    %cst_52 = arith.constant 6.500000e+00 : f32
    %139 = vector.broadcast %cst_52 : f32 to vector<8x1xf32>
    %140 = arith.cmpf ole, %134, %139 : vector<8x1xf32>
    %141 = arith.extui %140 : vector<8x1xi1> to vector<8x1xi32>
    %142 = arith.sitofp %141 : vector<8x1xi32> to vector<8x1xf32>
    %cst_53 = arith.constant 0.000000e+00 : f32
    %143 = vector.broadcast %cst_53 : f32 to vector<1x16xf32>
    %144 = vector.extract_strided_slice %126 {offsets = [0, 0], sizes = [7, 16], strides = [1, 1]} : vector<8x16xf32> to vector<7x16xf32>
    %145 = tpu.concatenate %143, %144 in 0 : vector<1x16xf32>, vector<7x16xf32> -> vector<8x16xf32>
    %146 = vector.broadcast %138 : vector<8x1xf32> to vector<8x16xf32>
    %147 = arith.mulf %145, %146 : vector<8x16xf32>
    %148 = vector.extract_strided_slice %126 {offsets = [1, 0], sizes = [7, 16], strides = [1, 1]} : vector<8x16xf32> to vector<7x16xf32>
    %149 = tpu.concatenate %148, %143 in 0 : vector<7x16xf32>, vector<1x16xf32> -> vector<8x16xf32>
    %150 = vector.broadcast %142 : vector<8x1xf32> to vector<8x16xf32>
    %151 = arith.mulf %149, %150 : vector<8x16xf32>
    %152 = arith.truncf %126 : vector<8x16xf32> to vector<8x16xbf16>
    %c0_54 = arith.constant 0 : index
    %c0_55 = arith.constant 0 : index
    %153 = vector.load %arg13[%c0_54, %c0_55] : memref<16x48xbf16, #tpu.memory_space<vmem>>, vector<16x48xbf16>
    %cst_56 = arith.constant dense<0.000000e+00> : vector<8x48xf32>
    %154 = tpu.matmul %152, %153, %cst_56 {dimension_numbers = #tpu.dot_dimension_numbers<[1], [0], [0], [1], [0, 0, 1, 1], [], []>} : vector<8x16xbf16>, vector<16x48xbf16>, vector<8x48xf32> -> vector<8x48xf32>
    %c0_57 = arith.constant 0 : index
    %c0_58 = arith.constant 0 : index
    %155 = vector.load %arg14[%c0_57, %c0_58] : memref<1x48xf32, #tpu.memory_space<vmem>>, vector<1x48xf32>
    %156 = vector.broadcast %155 : vector<1x48xf32> to vector<8x48xf32>
    %157 = arith.addf %154, %156 : vector<8x48xf32>
    %158 = arith.truncf %147 : vector<8x16xf32> to vector<8x16xbf16>
    %c0_59 = arith.constant 0 : index
    %c0_60 = arith.constant 0 : index
    %159 = vector.load %arg15[%c0_59, %c0_60] : memref<16x48xbf16, #tpu.memory_space<vmem>>, vector<16x48xbf16>
    %cst_61 = arith.constant dense<0.000000e+00> : vector<8x48xf32>
    %160 = tpu.matmul %158, %159, %cst_61 {dimension_numbers = #tpu.dot_dimension_numbers<[1], [0], [0], [1], [0, 0, 1, 1], [], []>} : vector<8x16xbf16>, vector<16x48xbf16>, vector<8x48xf32> -> vector<8x48xf32>
    %c0_62 = arith.constant 0 : index
    %c0_63 = arith.constant 0 : index
    %161 = vector.load %arg16[%c0_62, %c0_63] : memref<16x48xbf16, #tpu.memory_space<vmem>>, vector<16x48xbf16>
    %cst_64 = arith.constant dense<0.000000e+00> : vector<8x48xf32>
    %162 = tpu.matmul %152, %161, %cst_64 {dimension_numbers = #tpu.dot_dimension_numbers<[1], [0], [0], [1], [0, 0, 1, 1], [], []>} : vector<8x16xbf16>, vector<16x48xbf16>, vector<8x48xf32> -> vector<8x48xf32>
    %163 = arith.addf %160, %162 : vector<8x48xf32>
    %164 = arith.truncf %151 : vector<8x16xf32> to vector<8x16xbf16>
    %c0_65 = arith.constant 0 : index
    %c0_66 = arith.constant 0 : index
    %165 = vector.load %arg17[%c0_65, %c0_66] : memref<16x48xbf16, #tpu.memory_space<vmem>>, vector<16x48xbf16>
    %cst_67 = arith.constant dense<0.000000e+00> : vector<8x48xf32>
    %166 = tpu.matmul %164, %165, %cst_67 {dimension_numbers = #tpu.dot_dimension_numbers<[1], [0], [0], [1], [0, 0, 1, 1], [], []>} : vector<8x16xbf16>, vector<16x48xbf16>, vector<8x48xf32> -> vector<8x48xf32>
    %167 = arith.addf %163, %166 : vector<8x48xf32>
    %c0_68 = arith.constant 0 : index
    %c0_69 = arith.constant 0 : index
    %168 = vector.load %arg18[%c0_68, %c0_69] : memref<1x48xf32, #tpu.memory_space<vmem>>, vector<1x48xf32>
    %169 = vector.broadcast %168 : vector<1x48xf32> to vector<8x48xf32>
    %170 = arith.addf %167, %169 : vector<8x48xf32>
    %cst_70 = arith.constant 5.000000e-01 : f32
    %171 = vector.broadcast %cst_70 : f32 to vector<8x48xf32>
    %172 = arith.mulf %171, %157 : vector<8x48xf32>
    %cst_71 = arith.constant 0.707106769 : f32
    %173 = vector.broadcast %cst_71 : f32 to vector<8x48xf32>
    %174 = arith.mulf %157, %173 : vector<8x48xf32>
    %175 = math.erf %174 : vector<8x48xf32>
    %cst_72 = arith.constant 1.000000e+00 : f32
    %176 = vector.broadcast %cst_72 : f32 to vector<8x48xf32>
    %177 = arith.addf %176, %175 : vector<8x48xf32>
    %178 = arith.mulf %172, %177 : vector<8x48xf32>
    %cst_73 = arith.constant 5.000000e-01 : f32
    %179 = vector.broadcast %cst_73 : f32 to vector<8x48xf32>
    %180 = arith.mulf %179, %170 : vector<8x48xf32>
    %cst_74 = arith.constant 0.707106769 : f32
    %181 = vector.broadcast %cst_74 : f32 to vector<8x48xf32>
    %182 = arith.mulf %170, %181 : vector<8x48xf32>
    %183 = math.erf %182 : vector<8x48xf32>
    %cst_75 = arith.constant 1.000000e+00 : f32
    %184 = vector.broadcast %cst_75 : f32 to vector<8x48xf32>
    %185 = arith.addf %184, %183 : vector<8x48xf32>
    %186 = arith.mulf %180, %185 : vector<8x48xf32>
    %187 = arith.mulf %157, %186 : vector<8x48xf32>
    %188 = arith.mulf %170, %178 : vector<8x48xf32>
    %189 = arith.addf %187, %188 : vector<8x48xf32>
    %190 = arith.truncf %189 : vector<8x48xf32> to vector<8x48xbf16>
    %c0_76 = arith.constant 0 : index
    %c0_77 = arith.constant 0 : index
    %191 = vector.load %arg19[%c0_76, %c0_77] : memref<48x16xbf16, #tpu.memory_space<vmem>>, vector<48x16xbf16>
    %cst_78 = arith.constant dense<0.000000e+00> : vector<8x16xf32>
    %192 = tpu.matmul %190, %191, %cst_78 {dimension_numbers = #tpu.dot_dimension_numbers<[1], [0], [0], [1], [0, 0, 1, 1], [], []>} : vector<8x48xbf16>, vector<48x16xbf16>, vector<8x16xf32> -> vector<8x16xf32>
    %c0_79 = arith.constant 0 : index
    %c0_80 = arith.constant 0 : index
    %193 = vector.load %arg20[%c0_79, %c0_80] : memref<1x16xf32, #tpu.memory_space<vmem>>, vector<1x16xf32>
    %194 = vector.broadcast %193 : vector<1x16xf32> to vector<8x16xf32>
    %195 = arith.addf %192, %194 : vector<8x16xf32>
    %196 = arith.addf %101, %195 : vector<8x16xf32>
    %c0_81 = arith.constant 0 : index
    %c0_82 = arith.constant 0 : index
    %197 = vector.load %arg21[%c0_81, %c0_82] : memref<8x16xf32, #tpu.memory_space<vmem>>, vector<8x16xf32>
    tpu.vector_store %arg21[%c0_81, %c0_82], %196 {strides = array<i32>} : memref<8x16xf32, #tpu.memory_space<vmem>>, vector<8x16xf32>,
    return
  }
  func.func @transform_0(%arg0: i32) -> (i32, i32) {
    %c0_i32 = arith.constant 0 : i32
    %c0_i32_0 = arith.constant 0 : i32
    return %arg0, %c0_i32 : i32, i32
  }
  func.func @transform_1(%arg0: i32) -> (i32, i32) {
    %c0_i32 = arith.constant 0 : i32
    %c0_i32_0 = arith.constant 0 : i32
    %c0_i32_1 = arith.constant 0 : i32
    return %c0_i32, %c0_i32_0 : i32, i32
  }
  func.func @transform_2(%arg0: i32) -> (i32, i32) {
    %c0_i32 = arith.constant 0 : i32
    %c0_i32_0 = arith.constant 0 : i32
    %c0_i32_1 = arith.constant 0 : i32
    return %c0_i32, %c0_i32_0 : i32, i32
  }
  func.func @transform_3(%arg0: i32) -> (i32, i32) {
    %c0_i32 = arith.constant 0 : i32
    %c0_i32_0 = arith.constant 0 : i32
    %c0_i32_1 = arith.constant 0 : i32
    return %c0_i32, %c0_i32_0 : i32, i32
  }
  func.func @transform_4(%arg0: i32) -> (i32, i32) {
    %c0_i32 = arith.constant 0 : i32
    %c0_i32_0 = arith.constant 0 : i32
    %c0_i32_1 = arith.constant 0 : i32
    return %c0_i32, %c0_i32_0 : i32, i32
  }
  func.func @transform_5(%arg0: i32) -> (i32, i32) {
    %c0_i32 = arith.constant 0 : i32
    %c0_i32_0 = arith.constant 0 : i32
    %c0_i32_1 = arith.constant 0 : i32
    return %c0_i32, %c0_i32_0 : i32, i32
  }
  func.func @transform_6(%arg0: i32) -> (i32, i32) {
    %c0_i32 = arith.constant 0 : i32
    %c0_i32_0 = arith.constant 0 : i32
    %c0_i32_1 = arith.constant 0 : i32
    return %c0_i32, %c0_i32_0 : i32, i32
  }
  func.func @transform_7(%arg0: i32) -> (i32, i32) {
    %c0_i32 = arith.constant 0 : i32
    %c0_i32_0 = arith.constant 0 : i32
    %c0_i32_1 = arith.constant 0 : i32
    return %c0_i32, %c0_i32_0 : i32, i32
  }
  func.func @transform_8(%arg0: i32) -> (i32, i32) {
    %c0_i32 = arith.constant 0 : i32
    %c0_i32_0 = arith.constant 0 : i32
    %c0_i32_1 = arith.constant 0 : i32
    return %c0_i32, %c0_i32_0 : i32, i32
  }
  func.func @transform_9(%arg0: i32) -> (i32, i32) {
    %c0_i32 = arith.constant 0 : i32
    %c0_i32_0 = arith.constant 0 : i32
    %c0_i32_1 = arith.constant 0 : i32
    return %c0_i32, %c0_i32_0 : i32, i32
  }
  func.func @transform_10(%arg0: i32) -> (i32, i32) {
    %c0_i32 = arith.constant 0 : i32
    %c0_i32_0 = arith.constant 0 : i32
    %c0_i32_1 = arith.constant 0 : i32
    return %c0_i32, %c0_i32_0 : i32, i32
  }
  func.func @transform_11(%arg0: i32) -> (i32, i32) {
    %c0_i32 = arith.constant 0 : i32
    %c0_i32_0 = arith.constant 0 : i32
    %c0_i32_1 = arith.constant 0 : i32
    return %c0_i32, %c0_i32_0 : i32, i32
  }
  func.func @transform_12(%arg0: i32) -> (i32, i32) {
    %c0_i32 = arith.constant 0 : i32
    %c0_i32_0 = arith.constant 0 : i32
    %c0_i32_1 = arith.constant 0 : i32
    return %c0_i32, %c0_i32_0 : i32, i32
  }
  func.func @transform_13(%arg0: i32) -> (i32, i32) {
    %c0_i32 = arith.constant 0 : i32
    %c0_i32_0 = arith.constant 0 : i32
    %c0_i32_1 = arith.constant 0 : i32
    return %c0_i32, %c0_i32_0 : i32, i32
  }
  func.func @transform_14(%arg0: i32) -> (i32, i32) {
    %c0_i32 = arith.constant 0 : i32
    %c0_i32_0 = arith.constant 0 : i32
    %c0_i32_1 = arith.constant 0 : i32
    return %c0_i32, %c0_i32_0 : i32, i32
  }
  func.func @transform_15(%arg0: i32) -> (i32, i32) {
    %c0_i32 = arith.constant 0 : i32
    %c0_i32_0 = arith.constant 0 : i32
    %c0_i32_1 = arith.constant 0 : i32
    return %c0_i32, %c0_i32_0 : i32, i32
  }
  func.func @transform_16(%arg0: i32) -> (i32, i32) {
    %c0_i32 = arith.constant 0 : i32
    %c0_i32_0 = arith.constant 0 : i32
    %c0_i32_1 = arith.constant 0 : i32
    return %c0_i32, %c0_i32_0 : i32, i32
  }
  func.func @transform_17(%arg0: i32) -> (i32, i32) {
    %c0_i32 = arith.constant 0 : i32
    %c0_i32_0 = arith.constant 0 : i32
    %c0_i32_1 = arith.constant 0 : i32
    return %c0_i32, %c0_i32_0 : i32, i32
  }
  func.func @transform_18(%arg0: i32) -> (i32, i32) {
    %c0_i32 = arith.constant 0 : i32
    %c0_i32_0 = arith.constant 0 : i32
    %c0_i32_1 = arith.constant 0 : i32
    return %c0_i32, %c0_i32_0 : i32, i32
  }
  func.func @transform_19(%arg0: i32) -> (i32, i32) {
    %c0_i32 = arith.constant 0 : i32
    %c0_i32_0 = arith.constant 0 : i32
    %c0_i32_1 = arith.constant 0 : i32
    return %c0_i32, %c0_i32_0 : i32, i32
  }
  func.func @transform_20(%arg0: i32) -> (i32, i32) {
    %c0_i32 = arith.constant 0 : i32
    %c0_i32_0 = arith.constant 0 : i32
    return %arg0, %c0_i32 : i32, i32
  }
}

</mosaic_0001>

<bundles_post_ra>
// kernel: tpu_custom_call.1
= control target key start
LH: loop header
LB: loop body
LE: loop exit
PB: predicated region body
PF: predicated region fallthrough
CT: control target
= control target key end

     0   :  { %s3643_s0 = inlined_call_operand.hbm [shape: f32[16,16], index: 0, kind: input, shape index: {}]   ;;  %s3644_s1 = inlined_call_operand.hbm [shape: f32[16,8], index: 1, kind: input, shape index: {}]   ;;  %s3645_s2 = inlined_call_operand.hbm [shape: f32[8,16], index: 2, kind: input, shape index: {}]   ;;  %s3646_s3 = inlined_call_operand.hbm [shape: f32[1,16], index: 3, kind: input, shape index: {}]   ;;  %s3647_s4 = inlined_call_operand.hbm [shape: f32[1,16], index: 4, kind: input, shape index: {}]   ;;  %s3648_s5 = inlined_call_operand.hbm [shape: f32[1,16], index: 5, kind: input, shape index: {}]   ;;  %s3649_s6 = inlined_call_operand.hbm [shape: f32[1,16], index: 6, kind: input, shape index: {}]   ;;  %s3650_s7 = inlined_call_operand.hbm [shape: f32[1,16], index: 7, kind: input, shape index: {}]   ;;  %s3651_s8 = inlined_call_operand.hbm [shape: f32[1,16], index: 8, kind: input, shape index: {}]   ;;  %s3652_s9 = inlined_call_operand.<no memory space> [shape: f32[1,1], index: 9, kind: input, shape index: {}]   ;;  %s3653_s10 = inlined_call_operand.hbm [shape: f32[1,16], index: 10, kind: input, shape index: {}]   ;;  %s3654_s11 = inlined_call_operand.hbm [shape: f32[1,16], index: 11, kind: input, shape index: {}]   ;;  %s3655_s12 = inlined_call_operand.hbm [shape: bf16[16,48], index: 12, kind: input, shape index: {}]   ;;  %s3656_s13 = inlined_call_operand.hbm [shape: f32[1,48], index: 13, kind: input, shape index: {}]   ;;  %s3657_s14 = inlined_call_operand.hbm [shape: bf16[16,48], index: 14, kind: input, shape index: {}]   ;;  %s3658_s15 = inlined_call_operand.hbm [shape: bf16[16,48], index: 15, kind: input, shape index: {}]   ;;  %s3659_s16 = inlined_call_operand.hbm [shape: bf16[16,48], index: 16, kind: input, shape index: {}]   ;;  %s3660_s17 = inlined_call_operand.hbm [shape: f32[1,48], index: 17, kind: input, shape index: {}]   ;;  %s3661_s18 = inlined_call_operand.hbm [shape: bf16[48,16], index: 18, kind: input, shape index: {}]   ;;  %s3662_s19 = inlined_call_operand.hbm [shape: f32[1,16], index: 19, kind: input, shape index: {}]   ;;  %s3663_s20 = inlined_call_operand.hbm [shape: f32[16,16], index: 20, kind: output, shape index: {}]  }
   0x1   :  { %3686 = sst [smem:[#allocation52_spill]] %s3643_s0  ;;  %v25_v0 = vstv %s3652_s9 }
   0x2   :  { %3687 = sst [smem:[#allocation53_spill]] %s3644_s1  ;;  %26 = vst [vmem:[#allocation3] sm:$0x1] %v25_v0 }
   0x3   :  { %3688 = sst [smem:[#allocation54_spill]] %s3645_s2 }
   0x4   :  { %3689 = sst [smem:[#allocation55_spill]] %s3646_s3 }
   0x5   :  { %3690 = sst [smem:[#allocation56_spill]] %s3647_s4 }
   0x6   :  { %3691 = sst [smem:[#allocation57_spill]] %s3648_s5 }
   0x7   :  { %3692 = sst [smem:[#allocation58_spill]] %s3649_s6 }
   0x8   :  { %3693 = sst [smem:[#allocation59_spill]] %s3650_s7 }
   0x9   :  { %3694 = sst [smem:[#allocation60_spill]] %s3651_s8 }
   0xa   :  { %3695 = sst [smem:[#allocation61_spill]] %s3660_s17 }
   0xb   :  { %3696 = sst [smem:[#allocation62_spill]] %s3662_s19 }
   0xc   :  { %3697 = sst [smem:[#allocation63_spill]] %s3663_s20 }
   0xd   :  { %27 = vsyncpa [#allocation5], 0 }
   0xe   :  { %29 = vsyncpa [#allocation5 + $0x1], 0 }
   0xf   :  { %30 = vsyncpa [#allocation8], 0 }
  0x10   :  { %31 = vsyncpa [#allocation11], 0 }
  0x11   :  { %32 = vsyncpa [#allocation14], 0 }
  0x12   :  { %33 = vsyncpa [#allocation17], 0 }
  0x13   :  { %34 = vsyncpa [#allocation20], 0 }
  0x14   :  { %35 = vsyncpa [#allocation23], 0 }
  0x15   :  { %36 = vsyncpa [#allocation26], 0 }
  0x16   :  { %37 = vsyncpa [#allocation29], 0 }
  0x17   :  { %38 = vsyncpa [#allocation32], 0 }
  0x18   :  { %39 = vsyncpa [#allocation6], 0 }
  0x19   :  { %41 = vsyncpa [#allocation6 + $0x1], 0  ;;  %s2961_s23 = smov 0   ;;  %s2963_s24 = smov 0  }
  0x1a   :  { %s2965_s2 = smov 0   ;;  %s2967_s9 = smov 0  }
  0x1b LB: > { %3698 = sst [smem:[#allocation46_spill]] %s2811_s23  ;;  %s2825_s25 = smov [#allocation7]   ;;  %s2823_s9 = sphi %s2967_s9, %s3415_s9   ;;  %s2819_s2 = sphi %s2965_s2, %s3763_s2   ;;  %s2815_s24 = sphi %s2963_s24, %s3762_s24   ;;  %s2811_s23 = sphi %s2961_s23, %s3761_s23  }
  0x1c   : > { %3699 = sst [smem:[#allocation47_spill]] %s2815_s24  ;;  %s515_s3 = sshll.u32 %s2825_s25, 4  ;;  %s2987_s3 = int_to_ptr.vmem [resolvable:$true] %s515_s3 }
  0x1d   : > { %3700 = sst [smem:[#allocation48_spill]] %s2819_s2  ;;  %s2982_s26 = sadd.s32 4294967295, %s2823_s9  }
  0x1e   : > { %3701 = sst [smem:[#allocation49_spill]] %s2823_s9  ;;  %p1790_p0 = scmp.ge.s32.totalorder %s2823_s9, 1 }
  0x1f   : > { %3702 = sst [smem:[#allocation50_spill]] %s2982_s26  ;;  %p3680_p1 = scmp.eq.s32.totalorder %s2982_s26, 0 }
  0x20   : > { %p503_p2 = scmp.lt.s32.totalorder %s2823_s9, 3  ;;  %s2826_s28 = smov [#allocation10]  }
  0x21   : > { %s540_s4 = sshll.u32 %s2826_s28, 4  ;;  %s2827_s30 = smov [#allocation13]   ;;  %s3002_s4 = int_to_ptr.vmem [resolvable:$true] %s540_s4 }
  0x22   : > { %p2989_p3 = pnand %p1790_p0, %p503_p2  ;;  %s562_s0 = sshll.u32 %s2827_s30, 4  ;;  %s3004_s0 = int_to_ptr.vmem [resolvable:$true] %s562_s0 }
  0x23   : > { %s3706_s22 = sld [smem:[#allocation53_spill]] }
  0x24   : > { %s3703_s27 = scalar_select %p2989_p3, 1, 0 }
  0x25   : > { %p2010_p5 = pneg %p2989_p3 }
  0x26   : > { %3704 = sst [smem:[#allocation51_spill]] %s3703_s27 }
  0x27   : > { %p2998_p6 = pnand %p2010_p5, %p3680_p1 }
  0x29   : > { %s2187_s25 = scalar_lea.hbm %s3706_s22, 256  ;;  %p3014_p8 = pneg %p2998_p6 }
  0x2a   : > { %p2188_p7 = scmp.ne.s32.totalorder %s3706_s22, %s2187_s25  ;;  %p2194_p11 = scmp.lt.u32.totalorder %s2187_s25, %s3706_s22 }
  0x2c   : > { %p2190_p9 = pnand %p3014_p8, %p2188_p7 }
  0x2e   : > { %p2191_p10 = pneg %p2190_p9 }
  0x30   : > { %p2196_p12 = pnand %p2194_p11, %p2191_p10 }
  0x32   : > { %2199 = shalt.err (!%p2196_p12)
}
  0x33   : > { %s2200_s20 = scalar_lea.vmem %s2987_s3, 256  ;;  %p2208_p5 = scmp.lt.s32.totalorder %s2987_s3, %s2987_s3 }
  0x34   : > { %p2201_p13 = scmp.ne.s32.totalorder %s2987_s3, %s2200_s20  ;;  %p2209_p4 = scmp.lt.s32.totalorder %s2200_s20, %s2200_s20 }
  0x36   : > { %p2203_p0 = pnand %p2201_p13, %p3014_p8  ;;  %p2210_p7 = por %p2209_p4, %p2208_p5 }
  0x38   : > { %p2204_p2 = pneg %p2203_p0 }
  0x3a   : > { %p2211_p9 = pnand %p2210_p7, %p2204_p2 }
  0x3c   : > { %2214 = shalt.err (!%p2211_p9)
}
  0x3d   : > { %s2828_s27 = smov 128   ;;  %s2829_s26 = smov 8  }
  0x3e   : > { %2013 = dma.hbm_to_vmem [thread:$0]  (!%p2998_p6), %s3706_s22, 256, %s2987_s3, [#allocation8], %s2828_s27, %s2828_s27, %s2829_s26  }
  0x3f   : > { %s3708_s23 = sld [smem:[#allocation55_spill]] }
  0x45   : > { %s3709_s19 = smov %s3708_s23  ;;  %s2215_s24 = scalar_lea.hbm %s3708_s23, 16 }
  0x46   : > { %p2216_p4 = scmp.ne.s32.totalorder %s3709_s19, %s2215_s24  ;;  %p2222_p12 = scmp.lt.u32.totalorder %s2215_s24, %s3709_s19 }
  0x48   : > { %p2218_p10 = pnand %p2216_p4, %p3014_p8 }
  0x4a   : > { %p2219_p11 = pneg %p2218_p10 }
  0x4c   : > { %p2224_p13 = pnand %p2222_p12, %p2219_p11 }
  0x4e   : > { %2227 = shalt.err (!%p2224_p13)
}
  0x4f   : > { %s2228_s3 = scalar_lea.vmem %s3002_s4, 16  ;;  %s2235_s23 = scalar_lea.vmem %s3002_s4, 32 }
  0x50   : > { %p2229_p0 = scmp.ne.s32.totalorder %s3002_s4, %s2228_s3  ;;  %p2236_p7 = scmp.lt.s32.totalorder %s3002_s4, %s3002_s4 }
  0x51   : > { %p2237_p9 = scmp.lt.s32.totalorder %s2235_s23, %s2228_s3 }
  0x52   : > { %p2231_p2 = pnand %p2229_p0, %p3014_p8 }
  0x53   : > { %p2238_p4 = por %p2237_p9, %p2236_p7 }
  0x54   : > { %p2232_p5 = pneg %p2231_p2 }
  0x56   : > { %p2239_p10 = pnand %p2238_p4, %p2232_p5 }
  0x58   : > { %2242 = shalt.err (!%p2239_p10)
}
  0x59   : > { %2019 = dma.hbm_to_vmem [thread:$0]  (!%p2998_p6), %s3709_s19, 16, %s3002_s4, [#allocation11]  }
  0x5a   : > { %s3710_s5 = sld [smem:[#allocation57_spill]] }
  0x60   : > { %s2243_s27 = scalar_lea.hbm %s3710_s5, 16 }
  0x61   : > { %p2244_p11 = scmp.ne.s32.totalorder %s3710_s5, %s2243_s27  ;;  %p2250_p0 = scmp.lt.u32.totalorder %s2243_s27, %s3710_s5 }
  0x63   : > { %p2246_p12 = pnand %p2244_p11, %p3014_p8 }
  0x65   : > { %p2247_p13 = pneg %p2246_p12 }
  0x67   : > { %p2252_p2 = pnand %p2250_p0, %p2247_p13 }
  0x69   : > { %2255 = shalt.err (!%p2252_p2)
}
  0x6a   : > { %s2256_s4 = scalar_lea.vmem %s3004_s0, 16  ;;  %s2263_s30 = scalar_lea.vmem %s3004_s0, 32 }
  0x6b   : > { %p2257_p5 = scmp.ne.s32.totalorder %s3004_s0, %s2256_s4  ;;  %p2264_p4 = scmp.lt.s32.totalorder %s3004_s0, %s3004_s0 }
  0x6c   : > { %p2265_p10 = scmp.lt.s32.totalorder %s2263_s30, %s2256_s4 }
  0x6d   : > { %p2259_p7 = pnand %p2257_p5, %p3014_p8 }
  0x6e   : > { %p2266_p11 = por %p2265_p10, %p2264_p4 }
  0x6f   : > { %p2260_p9 = pneg %p2259_p7 }
  0x71   : > { %p2267_p12 = pnand %p2266_p11, %p2260_p9 }
  0x73   : > { %2270 = shalt.err (!%p2267_p12)
}
  0x74   : > { %2025 = dma.hbm_to_vmem [thread:$0]  (!%p2998_p6), %s3710_s5, 16, %s3004_s0, [#allocation14]  }
  0x75   : > { %s2830_s23 = smov [#allocation16]   ;;  %s2831_s24 = smov [#allocation19]  }
  0x76   : > { %s584_s17 = sshll.u32 %s2830_s23, 4  ;;  %s609_s2 = sshll.u32 %s2831_s24, 4  ;;  %s585_s17 = int_to_ptr.vmem [resolvable:$true] %s584_s17  ;;  %s610_s2 = int_to_ptr.vmem [resolvable:$true] %s609_s2 }
  0x77   : > { %s3711_s7 = sld [smem:[#allocation59_spill]] }
  0x7d   : > { %s2271_s26 = scalar_lea.hbm %s3711_s7, 16 }
  0x7e   : > { %p2272_p13 = scmp.ne.s32.totalorder %s3711_s7, %s2271_s26  ;;  %p2278_p5 = scmp.lt.u32.totalorder %s2271_s26, %s3711_s7 }
  0x80   : > { %p2274_p0 = pnand %p2272_p13, %p3014_p8 }
  0x82   : > { %p2275_p2 = pneg %p2274_p0 }
  0x84   : > { %p2280_p7 = pnand %p2278_p5, %p2275_p2 }
  0x86   : > { %2283 = shalt.err (!%p2280_p7)
}
  0x87   : > { %s2284_s0 = scalar_lea.vmem %s585_s17, 16  ;;  %s2291_s30 = scalar_lea.vmem %s585_s17, 32 }
  0x88   : > { %p2285_p9 = scmp.ne.s32.totalorder %s585_s17, %s2284_s0  ;;  %p2292_p11 = scmp.lt.s32.totalorder %s585_s17, %s585_s17 }
  0x89   : > { %p2293_p12 = scmp.lt.s32.totalorder %s2291_s30, %s2284_s0 }
  0x8a   : > { %p2287_p4 = pnand %p2285_p9, %p3014_p8 }
  0x8b   : > { %p2294_p1 = por %p2293_p12, %p2292_p11 }
  0x8c   : > { %p2288_p10 = pneg %p2287_p4 }
  0x8e   : > { %p2295_p3 = pnand %p2294_p1, %p2288_p10 }
  0x90   : > { %2298 = shalt.err (!%p2295_p3)
}
  0x91   : > { %2031 = dma.hbm_to_vmem [thread:$0]  (!%p2998_p6), %s3711_s7, 16, %s585_s17, [#allocation17]  }
  0x92   : > { %s2299_s9 = scalar_lea.hbm %s3653_s10, 16 }
  0x93   : > { %p2300_p13 = scmp.ne.s32.totalorder %s3653_s10, %s2299_s9  ;;  %p2306_p3 = scmp.lt.u32.totalorder %s2299_s9, %s3653_s10 }
  0x95   : > { %p2302_p0 = pnand %p2300_p13, %p3014_p8 }
  0x97   : > { %p2303_p1 = pneg %p2302_p0 }
  0x99   : > { %p2308_p2 = pnand %p2306_p3, %p2303_p1 }
  0x9b   : > { %2311 = shalt.err (!%p2308_p2)
}
  0x9c   : > { %s2312_s25 = scalar_lea.vmem %s610_s2, 16  ;;  %s2319_s17 = scalar_lea.vmem %s610_s2, 32 }
  0x9d   : > { %p2313_p5 = scmp.ne.s32.totalorder %s610_s2, %s2312_s25  ;;  %p2320_p4 = scmp.lt.s32.totalorder %s610_s2, %s610_s2 }
  0x9e   : > { %p2321_p10 = scmp.lt.s32.totalorder %s2319_s17, %s2312_s25 }
  0x9f   : > { %p2315_p7 = pnand %p2313_p5, %p3014_p8 }
  0xa0   : > { %p2322_p11 = por %p2321_p10, %p2320_p4 }
  0xa1   : > { %p2316_p9 = pneg %p2315_p7 }
  0xa3   : > { %p2323_p12 = pnand %p2322_p11, %p2316_p9 }
  0xa5   : > { %2326 = shalt.err (!%p2323_p12)
}
  0xa6   : > { %2037 = dma.hbm_to_vmem [thread:$0]  (!%p2998_p6), %s3653_s10, 16, %s610_s2, [#allocation20]  }
  0xa7   : > { %s2832_s30 = smov [#allocation22]   ;;  %s2327_s24 = scalar_lea.hbm %s3655_s12, 128 }
  0xa8   : > { %s630_s20 = sshll.u32 %s2832_s30, 4  ;;  %p2328_p13 = scmp.ne.s32.totalorder %s3655_s12, %s2327_s24  ;;  %s631_s20 = int_to_ptr.vmem [resolvable:$true] %s630_s20 }
  0xa9   : > { %p2334_p3 = scmp.lt.u32.totalorder %s2327_s24, %s3655_s12 }
  0xaa   : > { %p2330_p0 = pnand %p2328_p13, %p3014_p8 }
  0xac   : > { %p2331_p1 = pneg %p2330_p0 }
  0xae   : > { %p2336_p2 = pnand %p2334_p3, %p2331_p1 }
  0xb0   : > { %2339 = shalt.err (!%p2336_p2)
}
  0xb1   : > { %s2340_s2 = scalar_lea.vmem %s631_s20, 128  ;;  %p2348_p4 = scmp.lt.s32.totalorder %s631_s20, %s631_s20 }
  0xb2   : > { %p2341_p5 = scmp.ne.s32.totalorder %s631_s20, %s2340_s2  ;;  %p2349_p10 = scmp.lt.s32.totalorder %s2340_s2, %s2340_s2 }
  0xb4   : > { %p2343_p7 = pnand %p2341_p5, %p3014_p8  ;;  %p2350_p11 = por %p2349_p10, %p2348_p4 }
  0xb6   : > { %p2344_p9 = pneg %p2343_p7 }
  0xb8   : > { %p2351_p12 = pnand %p2350_p11, %p2344_p9 }
  0xba   : > { %2354 = shalt.err (!%p2351_p12)
}
  0xbb   : > { %s3682_s1 = smov 64   ;;  %s2834_s25 = smov 4  }
  0xbc   : > { %2043 = dma.hbm_to_vmem [thread:$0]  (!%p2998_p6), %s3655_s12, 128, %s631_s20, [#allocation23], %s3682_s1, %s3682_s1, %s2834_s25  }
  0xbd   : > { %s2835_s0 = smov [#allocation25]   ;;  %s2836_s3 = smov [#allocation28]  }
  0xbe   : > { %s654_s30 = sshll.u32 %s2835_s0, 4  ;;  %s680_s23 = sshll.u32 %s2836_s3, 4  ;;  %s655_s30 = int_to_ptr.vmem [resolvable:$true] %s654_s30  ;;  %s3140_s23 = int_to_ptr.vmem [resolvable:$true] %s680_s23 }
  0xbf   : > { %s2355_s27 = scalar_lea.hbm %s3657_s14, 128 }
  0xc0   : > { %p2356_p13 = scmp.ne.s32.totalorder %s3657_s14, %s2355_s27  ;;  %p2362_p3 = scmp.lt.u32.totalorder %s2355_s27, %s3657_s14 }
  0xc2   : > { %p2358_p0 = pnand %p2356_p13, %p3014_p8 }
  0xc4   : > { %p2359_p1 = pneg %p2358_p0 }
  0xc6   : > { %p2364_p2 = pnand %p2362_p3, %p2359_p1 }
  0xc8   : > { %2367 = shalt.err (!%p2364_p2)
}
  0xc9   : > { %s2368_s17 = scalar_lea.vmem %s655_s30, 128  ;;  %p2376_p4 = scmp.lt.s32.totalorder %s655_s30, %s655_s30 }
  0xca   : > { %p2369_p5 = scmp.ne.s32.totalorder %s655_s30, %s2368_s17  ;;  %p2377_p10 = scmp.lt.s32.totalorder %s2368_s17, %s2368_s17 }
  0xcc   : > { %p2371_p7 = pnand %p2369_p5, %p3014_p8  ;;  %p2378_p11 = por %p2377_p10, %p2376_p4 }
  0xce   : > { %p2372_p9 = pneg %p2371_p7 }
  0xd0   : > { %p2379_p12 = pnand %p2378_p11, %p2372_p9 }
  0xd2   : > { %2382 = shalt.err (!%p2379_p12)
}
  0xd3   : > { %2049 = dma.hbm_to_vmem [thread:$0]  (!%p2998_p6), %s3657_s14, 128, %s655_s30, [#allocation26], %s3682_s1, %s3682_s1, %s2834_s25  }
  0xd4   : > { %s2383_s9 = scalar_lea.hbm %s3659_s16, 128 }
  0xd5   : > { %p2384_p13 = scmp.ne.s32.totalorder %s3659_s16, %s2383_s9  ;;  %p2390_p3 = scmp.lt.u32.totalorder %s2383_s9, %s3659_s16 }
  0xd7   : > { %p2386_p0 = pnand %p2384_p13, %p3014_p8 }
  0xd9   : > { %p2387_p1 = pneg %p2386_p0 }
  0xdb   : > { %p2392_p2 = pnand %p2390_p3, %p2387_p1 }
  0xdd   : > { %2395 = shalt.err (!%p2392_p2)
}
  0xde   : > { %s2396_s30 = scalar_lea.vmem %s3140_s23, 128  ;;  %p2404_p4 = scmp.lt.s32.totalorder %s3140_s23, %s3140_s23 }
  0xdf   : > { %p2397_p5 = scmp.ne.s32.totalorder %s3140_s23, %s2396_s30  ;;  %p2405_p10 = scmp.lt.s32.totalorder %s2396_s30, %s2396_s30 }
  0xe1   : > { %p2399_p7 = pnand %p2397_p5, %p3014_p8  ;;  %p2406_p11 = por %p2405_p10, %p2404_p4 }
  0xe3   : > { %p2400_p9 = pneg %p2399_p7 }
  0xe5   : > { %p2407_p12 = pnand %p2406_p11, %p2400_p9 }
  0xe7   : > { %2410 = shalt.err (!%p2407_p12)
}
  0xe8   : > { %2055 = dma.hbm_to_vmem [thread:$0]  (!%p2998_p6), %s3659_s16, 128, %s3140_s23, [#allocation29], %s3682_s1, %s3682_s1, %s2834_s25  }
  0xe9   : > { %s2837_s4 = smov [#allocation31]   ;;  %s2838_s3 = smov [#allocation9]  }
  0xea   : > { %s704_s0 = sshll.u32 %s2837_s4, 4  ;;  %s529_s24 = sshll.u32 %s2838_s3, 4  ;;  %s705_s0 = int_to_ptr.vmem [resolvable:$true] %s704_s0  ;;  %s3189_s24 = int_to_ptr.vmem [resolvable:$true] %s529_s24 }
  0xeb   : > { %s2411_s26 = scalar_lea.hbm %s3661_s18, 384 }
  0xec   : > { %p2412_p13 = scmp.ne.s32.totalorder %s3661_s18, %s2411_s26  ;;  %p2418_p3 = scmp.lt.u32.totalorder %s2411_s26, %s3661_s18 }
  0xee   : > { %p2414_p0 = pnand %p2412_p13, %p3014_p8 }
  0xf0   : > { %p2415_p1 = pneg %p2414_p0 }
  0xf2   : > { %p2420_p2 = pnand %p2418_p3, %p2415_p1 }
  0xf4   : > { %2423 = shalt.err (!%p2420_p2)
}
  0xf5   : > { %s2424_s20 = scalar_lea.vmem %s705_s0, 384  ;;  %p2432_p4 = scmp.lt.s32.totalorder %s705_s0, %s705_s0 }
  0xf6   : > { %p2425_p5 = scmp.ne.s32.totalorder %s705_s0, %s2424_s20  ;;  %p2433_p10 = scmp.lt.s32.totalorder %s2424_s20, %s2424_s20 }
  0xf8   : > { %p2427_p7 = pnand %p2425_p5, %p3014_p8  ;;  %p2434_p11 = por %p2433_p10, %p2432_p4 }
  0xfa   : > { %p2428_p9 = pneg %p2427_p7 }
  0xfc   : > { %p2435_p12 = pnand %p2434_p11, %p2428_p9 }
  0xfe   : > { %2438 = shalt.err (!%p2435_p12)
}
  0xff   : > { %2061 = dma.hbm_to_vmem [thread:$0]  (!%p2998_p6), %s3661_s18, 384, %s705_s0, [#allocation32], %s3682_s1, %s3682_s1, %s2834_s25  }
 0x100   : > { %s3712_s27 = sld [smem:[#allocation54_spill]] }
 0x106   : > { %s2439_s26 = scalar_lea.hbm %s3712_s27, 128 }
 0x107   : > { %p2440_p13 = scmp.ne.s32.totalorder %s3712_s27, %s2439_s26  ;;  %p2446_p3 = scmp.lt.u32.totalorder %s2439_s26, %s3712_s27 }
 0x109   : > { %p2442_p0 = pnand %p2440_p13, %p3014_p8 }
 0x10b   : > { %p2443_p1 = pneg %p2442_p0 }
 0x10d   : > { %p2448_p2 = pnand %p2446_p3, %p2443_p1 }
 0x10f   : > { %2451 = shalt.err (!%p2448_p2)
}
 0x110   : > { %s2452_s0 = scalar_lea.vmem %s3189_s24, 128  ;;  %p2460_p4 = scmp.lt.s32.totalorder %s3189_s24, %s3189_s24 }
 0x111   : > { %p2453_p5 = scmp.ne.s32.totalorder %s3189_s24, %s2452_s0  ;;  %p2461_p10 = scmp.lt.s32.totalorder %s2452_s0, %s2452_s0 }
 0x113   : > { %p2455_p7 = pnand %p2453_p5, %p3014_p8  ;;  %p2462_p11 = por %p2461_p10, %p2460_p4 }
 0x115   : > { %p2456_p9 = pneg %p2455_p7 }
 0x117   : > { %p2463_p12 = pnand %p2462_p11, %p2456_p9 }
 0x119   : > { %2466 = shalt.err (!%p2463_p12)
}
 0x11a   : > { %2016 = dma.hbm_to_vmem [thread:$0]  (!%p2998_p6), %s3712_s27, 128, %s3189_s24, [#allocation8]  }
 0x11b   : > { %s2839_s4 = smov [#allocation12]   ;;  %s2840_s9 = smov [#allocation15]  }
 0x11c   : > { %s551_s3 = sshll.u32 %s2839_s4, 4  ;;  %s573_s26 = sshll.u32 %s2840_s9, 4  ;;  %s552_s3 = int_to_ptr.vmem [resolvable:$true] %s551_s3  ;;  %s3235_s26 = int_to_ptr.vmem [resolvable:$true] %s573_s26 }
 0x11d   : > { %s3713_s30 = sld [smem:[#allocation56_spill]] }
 0x123   : > { %s2467_s23 = scalar_lea.hbm %s3713_s30, 16 }
 0x124   : > { %p2468_p13 = scmp.ne.s32.totalorder %s3713_s30, %s2467_s23  ;;  %p2474_p3 = scmp.lt.u32.totalorder %s2467_s23, %s3713_s30 }
 0x126   : > { %p2470_p0 = pnand %p2468_p13, %p3014_p8 }
 0x128   : > { %p2471_p1 = pneg %p2470_p0 }
 0x12a   : > { %p2476_p2 = pnand %p2474_p3, %p2471_p1 }
 0x12c   : > { %2479 = shalt.err (!%p2476_p2)
}
 0x12d   : > { %s2480_s17 = scalar_lea.vmem %s552_s3, 16  ;;  %s2487_s4 = scalar_lea.vmem %s552_s3, 32 }
 0x12e   : > { %p2481_p5 = scmp.ne.s32.totalorder %s552_s3, %s2480_s17  ;;  %p2488_p4 = scmp.lt.s32.totalorder %s552_s3, %s552_s3 }
 0x12f   : > { %p2489_p10 = scmp.lt.s32.totalorder %s2487_s4, %s2480_s17 }
 0x130   : > { %p2483_p7 = pnand %p2481_p5, %p3014_p8 }
 0x131   : > { %p2490_p11 = por %p2489_p10, %p2488_p4 }
 0x132   : > { %p2484_p9 = pneg %p2483_p7 }
 0x134   : > { %p2491_p12 = pnand %p2490_p11, %p2484_p9 }
 0x136   : > { %2494 = shalt.err (!%p2491_p12)
}
 0x137   : > { %2022 = dma.hbm_to_vmem [thread:$0]  (!%p2998_p6), %s3713_s30, 16, %s552_s3, [#allocation11]  }
 0x138   : > { %s3714_s6 = sld [smem:[#allocation58_spill]] }
 0x13e   : > { %s2495_s23 = scalar_lea.hbm %s3714_s6, 16 }
 0x13f   : > { %p2496_p13 = scmp.ne.s32.totalorder %s3714_s6, %s2495_s23  ;;  %p2502_p3 = scmp.lt.u32.totalorder %s2495_s23, %s3714_s6 }
 0x141   : > { %p2498_p0 = pnand %p2496_p13, %p3014_p8 }
 0x143   : > { %p2499_p1 = pneg %p2498_p0 }
 0x145   : > { %p2504_p2 = pnand %p2502_p3, %p2499_p1 }
 0x147   : > { %2507 = shalt.err (!%p2504_p2)
}
 0x148   : > { %s2508_s3 = scalar_lea.vmem %s3235_s26, 16  ;;  %s2515_s4 = scalar_lea.vmem %s3235_s26, 32 }
 0x149   : > { %p2509_p5 = scmp.ne.s32.totalorder %s3235_s26, %s2508_s3  ;;  %p2516_p4 = scmp.lt.s32.totalorder %s3235_s26, %s3235_s26 }
 0x14a   : > { %p2517_p10 = scmp.lt.s32.totalorder %s2515_s4, %s2508_s3 }
 0x14b   : > { %p2511_p7 = pnand %p2509_p5, %p3014_p8 }
 0x14c   : > { %p2518_p11 = por %p2517_p10, %p2516_p4 }
 0x14d   : > { %p2512_p9 = pneg %p2511_p7 }
 0x14f   : > { %p2519_p12 = pnand %p2518_p11, %p2512_p9 }
 0x151   : > { %2522 = shalt.err (!%p2519_p12)
}
 0x152   : > { %2028 = dma.hbm_to_vmem [thread:$0]  (!%p2998_p6), %s3714_s6, 16, %s3235_s26, [#allocation14]  }
 0x153   : > { %s2841_s21 = smov [#allocation18]   ;;  %s2842_s23 = smov [#allocation21]  }
 0x154   : > { %s595_s2 = sshll.u32 %s2841_s21, 4  ;;  %s620_s0 = sshll.u32 %s2842_s23, 4  ;;  %s596_s2 = int_to_ptr.vmem [resolvable:$true] %s595_s2  ;;  %s3279_s0 = int_to_ptr.vmem [resolvable:$true] %s620_s0 }
 0x155   : > { %s3715_s8 = sld [smem:[#allocation60_spill]] }
 0x15b   : > { %s2523_s17 = scalar_lea.hbm %s3715_s8, 16 }
 0x15c   : > { %p2524_p13 = scmp.ne.s32.totalorder %s3715_s8, %s2523_s17  ;;  %p2530_p3 = scmp.lt.u32.totalorder %s2523_s17, %s3715_s8 }
 0x15e   : > { %p2526_p0 = pnand %p2524_p13, %p3014_p8 }
 0x160   : > { %p2527_p1 = pneg %p2526_p0 }
 0x162   : > { %p2532_p2 = pnand %p2530_p3, %p2527_p1 }
 0x164   : > { %2535 = shalt.err (!%p2532_p2)
}
 0x165   : > { %s2536_s9 = scalar_lea.vmem %s596_s2, 16  ;;  %s2543_s21 = scalar_lea.vmem %s596_s2, 32 }
 0x166   : > { %p2537_p5 = scmp.ne.s32.totalorder %s596_s2, %s2536_s9  ;;  %p2544_p4 = scmp.lt.s32.totalorder %s596_s2, %s596_s2 }
 0x167   : > { %p2545_p10 = scmp.lt.s32.totalorder %s2543_s21, %s2536_s9 }
 0x168   : > { %p2539_p7 = pnand %p2537_p5, %p3014_p8 }
 0x169   : > { %p2546_p11 = por %p2545_p10, %p2544_p4 }
 0x16a   : > { %p2540_p9 = pneg %p2539_p7 }
 0x16c   : > { %p2547_p12 = pnand %p2546_p11, %p2540_p9 }
 0x16e   : > { %2550 = shalt.err (!%p2547_p12)
}
 0x16f   : > { %2034 = dma.hbm_to_vmem [thread:$0]  (!%p2998_p6), %s3715_s8, 16, %s596_s2, [#allocation17]  }
 0x170   : > { %s2551_s3 = scalar_lea.hbm %s3654_s11, 16 }
 0x171   : > { %p2552_p13 = scmp.ne.s32.totalorder %s3654_s11, %s2551_s3  ;;  %p2558_p3 = scmp.lt.u32.totalorder %s2551_s3, %s3654_s11 }
 0x173   : > { %p2554_p0 = pnand %p2552_p13, %p3014_p8 }
 0x175   : > { %p2555_p1 = pneg %p2554_p0 }
 0x177   : > { %p2560_p2 = pnand %p2558_p3, %p2555_p1 }
 0x179   : > { %2563 = shalt.err (!%p2560_p2)
}
 0x17a   : > { %s2564_s2 = scalar_lea.vmem %s3279_s0, 16  ;;  %s2571_s21 = scalar_lea.vmem %s3279_s0, 32 }
 0x17b   : > { %p2565_p5 = scmp.ne.s32.totalorder %s3279_s0, %s2564_s2  ;;  %p2572_p4 = scmp.lt.s32.totalorder %s3279_s0, %s3279_s0 }
 0x17c   : > { %p2573_p10 = scmp.lt.s32.totalorder %s2571_s21, %s2564_s2 }
 0x17d   : > { %p2567_p7 = pnand %p2565_p5, %p3014_p8 }
 0x17e   : > { %p2574_p11 = por %p2573_p10, %p2572_p4 }
 0x17f   : > { %p2568_p9 = pneg %p2567_p7 }
 0x181   : > { %p2575_p12 = pnand %p2574_p11, %p2568_p9 }
 0x183   : > { %2578 = shalt.err (!%p2575_p12)
}
 0x184   : > { %2040 = dma.hbm_to_vmem [thread:$0]  (!%p2998_p6), %s3654_s11, 16, %s3279_s0, [#allocation20]  }
 0x185   : > { %s2843_s24 = smov [#allocation24]   ;;  %s2844_s3 = smov [#allocation27]  }
 0x186   : > { %s644_s17 = sshll.u32 %s2843_s24, 4  ;;  %s667_s4 = sshll.u32 %s2844_s3, 4  ;;  %s645_s17 = int_to_ptr.vmem [resolvable:$true] %s644_s17  ;;  %s3323_s4 = int_to_ptr.vmem [resolvable:$true] %s667_s4 }
 0x187   : > { %s2579_s9 = scalar_lea.hbm %s3656_s13, 16 }
 0x188   : > { %p2580_p13 = scmp.ne.s32.totalorder %s3656_s13, %s2579_s9  ;;  %p2586_p3 = scmp.lt.u32.totalorder %s2579_s9, %s3656_s13 }
 0x18a   : > { %p2582_p0 = pnand %p2580_p13, %p3014_p8 }
 0x18c   : > { %p2583_p1 = pneg %p2582_p0 }
 0x18e   : > { %p2588_p2 = pnand %p2586_p3, %p2583_p1 }
 0x190   : > { %2591 = shalt.err (!%p2588_p2)
}
 0x191   : > { %s2592_s20 = scalar_lea.vmem %s645_s17, 16  ;;  %s2599_s24 = scalar_lea.vmem %s645_s17, 32 }
 0x192   : > { %p2593_p5 = scmp.ne.s32.totalorder %s645_s17, %s2592_s20  ;;  %p2600_p4 = scmp.lt.s32.totalorder %s645_s17, %s645_s17 }
 0x193   : > { %p2601_p10 = scmp.lt.s32.totalorder %s2599_s24, %s2592_s20 }
 0x194   : > { %p2595_p7 = pnand %p2593_p5, %p3014_p8 }
 0x195   : > { %p2602_p11 = por %p2601_p10, %p2600_p4 }
 0x196   : > { %p2596_p9 = pneg %p2595_p7 }
 0x198   : > { %p2603_p12 = pnand %p2602_p11, %p2596_p9 }
 0x19a   : > { %2606 = shalt.err (!%p2603_p12)
}
 0x19b   : > { %2046 = dma.hbm_to_vmem [thread:$0]  (!%p2998_p6), %s3656_s13, 16, %s645_s17, [#allocation23]  }
 0x19c   : > { %s2607_s2 = scalar_lea.hbm %s3658_s15, 128 }
 0x19d   : > { %p2608_p13 = scmp.ne.s32.totalorder %s3658_s15, %s2607_s2  ;;  %p2614_p3 = scmp.lt.u32.totalorder %s2607_s2, %s3658_s15 }
 0x19f   : > { %p2610_p0 = pnand %p2608_p13, %p3014_p8 }
 0x1a1   : > { %p2611_p1 = pneg %p2610_p0 }
 0x1a3   : > { %p2616_p2 = pnand %p2614_p3, %p2611_p1 }
 0x1a5   : > { %2619 = shalt.err (!%p2616_p2)
}
 0x1a6   : > { %s2620_s17 = scalar_lea.vmem %s3323_s4, 128  ;;  %p2628_p4 = scmp.lt.s32.totalorder %s3323_s4, %s3323_s4 }
 0x1a7   : > { %p2621_p5 = scmp.ne.s32.totalorder %s3323_s4, %s2620_s17  ;;  %p2629_p10 = scmp.lt.s32.totalorder %s2620_s17, %s2620_s17 }
 0x1a9   : > { %p2623_p7 = pnand %p2621_p5, %p3014_p8  ;;  %p2630_p11 = por %p2629_p10, %p2628_p4 }
 0x1ab   : > { %p2624_p9 = pneg %p2623_p7 }
 0x1ad   : > { %p2631_p12 = pnand %p2630_p11, %p2624_p9 }
 0x1af   : > { %2634 = shalt.err (!%p2631_p12)
}
 0x1b0   : > { %s3716_s24 = smov 64   ;;  %s2845_s26 = smov [#allocation30]  }
 0x1b1   : > { %2052 = dma.hbm_to_vmem [thread:$0]  (!%p2998_p6), %s3658_s15, 128, %s3323_s4, [#allocation26], %s3716_s24, %s3716_s24, %s2834_s25  }
 0x1b2   : > { %s694_s9 = sshll.u32 %s2845_s26, 4  ;;  %s2846_s2 = smov [#allocation33]   ;;  %s695_s9 = int_to_ptr.vmem [resolvable:$true] %s694_s9 }
 0x1b3   : > { %s718_s21 = sshll.u32 %s2846_s2, 4  ;;  %s3717_s20 = sld [smem:[#allocation61_spill]]  ;;  %s3369_s21 = int_to_ptr.vmem [resolvable:$true] %s718_s21 }
 0x1b9   : > { %s2635_s17 = scalar_lea.hbm %s3717_s20, 16 }
 0x1ba   : > { %p2636_p13 = scmp.ne.s32.totalorder %s3717_s20, %s2635_s17  ;;  %p2642_p3 = scmp.lt.u32.totalorder %s2635_s17, %s3717_s20 }
 0x1bc   : > { %p2638_p0 = pnand %p2636_p13, %p3014_p8 }
 0x1be   : > { %p2639_p1 = pneg %p2638_p0 }
 0x1c0   : > { %p2644_p2 = pnand %p2642_p3, %p2639_p1 }
 0x1c2   : > { %2647 = shalt.err (!%p2644_p2)
}
 0x1c3   : > { %s2648_s4 = scalar_lea.vmem %s695_s9, 16  ;;  %s2655_s24 = scalar_lea.vmem %s695_s9, 32 }
 0x1c4   : > { %p2649_p5 = scmp.ne.s32.totalorder %s695_s9, %s2648_s4  ;;  %p2656_p4 = scmp.lt.s32.totalorder %s695_s9, %s695_s9 }
 0x1c5   : > { %p2657_p10 = scmp.lt.s32.totalorder %s2655_s24, %s2648_s4 }
 0x1c6   : > { %p2651_p7 = pnand %p2649_p5, %p3014_p8 }
 0x1c7   : > { %p2658_p11 = por %p2657_p10, %p2656_p4 }
 0x1c8   : > { %p2652_p9 = pneg %p2651_p7 }
 0x1ca   : > { %p2659_p12 = pnand %p2658_p11, %p2652_p9 }
 0x1cc   : > { %2662 = shalt.err (!%p2659_p12)
}
 0x1cd   : > { %2058 = dma.hbm_to_vmem [thread:$0]  (!%p2998_p6), %s3717_s20, 16, %s695_s9, [#allocation29]  }
 0x1ce   : > { %s3718_s2 = sld [smem:[#allocation62_spill]] }
 0x1d4   : > { %s3719_s0 = smov %s3718_s2  ;;  %s2663_s23 = scalar_lea.hbm %s3718_s2, 16 }
 0x1d5   : > { %p2664_p13 = scmp.ne.s32.totalorder %s3719_s0, %s2663_s23  ;;  %p2670_p3 = scmp.lt.u32.totalorder %s2663_s23, %s3719_s0 }
 0x1d7   : > { %p2666_p0 = pnand %p2664_p13, %p3014_p8 }
 0x1d9   : > { %p2667_p1 = pneg %p2666_p0 }
 0x1db   : > { %p2672_p2 = pnand %p2670_p3, %p2667_p1 }
 0x1dd   : > { %2675 = shalt.err (!%p2672_p2)
}
 0x1de   : > { %s2676_s9 = scalar_lea.vmem %s3369_s21, 16  ;;  %s2683_s24 = scalar_lea.vmem %s3369_s21, 32 }
 0x1df   : > { %p2677_p5 = scmp.ne.s32.totalorder %s3369_s21, %s2676_s9  ;;  %p2684_p4 = scmp.lt.s32.totalorder %s3369_s21, %s3369_s21 }
 0x1e0   : > { %p2685_p10 = scmp.lt.s32.totalorder %s2683_s24, %s2676_s9 }
 0x1e1   : > { %p2679_p7 = pnand %p2677_p5, %p3014_p8 }
 0x1e2   : > { %p2686_p11 = por %p2685_p10, %p2684_p4 }
 0x1e3   : > { %p2680_p9 = pneg %p2679_p7 }
 0x1e5   : > { %p2687_p12 = pnand %p2686_p11, %p2680_p9 }
 0x1e7   : > { %2690 = shalt.err (!%p2687_p12)
}
 0x1e8   : > { %s3720_s1 = sld [smem:[#allocation49_spill]]  ;;  %s3721_s26 = sld [smem:[#allocation48_spill]] }
 0x1e9   : > { %s3722_s28 = sld [smem:[#allocation47_spill]]  ;;  %s3723_s2 = sld [smem:[#allocation46_spill]] }
 0x1ea   : > { %s3724_s23 = sld [smem:[#allocation50_spill]] }
 0x1eb   : > { %2064 = dma.hbm_to_vmem [thread:$0]  (!%p2998_p6), %s3719_s0, 16, %s3369_s21, [#allocation32]  }
 0x1ec   : > { %s3730_s0 = sld [smem:[#allocation52_spill]] }
 0x1ee   : > { %s1789_s29 = sadd.s32 4294967294, %s3720_s1   ;;  %s3415_s9 = sadd.s32 1, %s3720_s1  }
 0x1ef   : > { %s51_s17 = ssub.s32 %s3720_s1, %s3415_s9  ;;  %s54_s3 = sadd.s32 1, %s3721_s26 }
 0x1f0   : > { %p52_p8 = scmp.eq.s32.totalorder %s51_s17, 0  ;;  %p61_p13 = scmp.ne.s32.totalorder %s3721_s26, %s3722_s28 }
 0x1f1   : > { %p62_p0 = scmp.eq.s32.totalorder %s3720_s1, 0  ;;  %p67_p1 = scmp.ne.s32.totalorder %s3722_s28, %s3723_s2 }
 0x1f2   : > { %s3426_s25 = scalar_select %p52_p8, %s3721_s26, %s54_s3  }
 0x1f3   : > { %p3428_p3 = por %p62_p0, %p61_p13  ;;  %p3726_p2 = scmp.eq.s32.totalorder %s3724_s23, 0 }
 0x1f4   : > { %p490_p5 = scmp.eq.s32.totalorder %s3724_s23, 1  ;;  %p496_p7 = scmp.eq.s32.totalorder %s1789_s29, 1 }
 0x1f5   : > { %p3434_p6 = por %p3726_p2, %p67_p1  ;;  %p2091_p9 = scmp.lt.s32.totalorder %s3720_s1, 2 }
 0x1f6   : > { %s729_s24 = sand.u32 1, %s3721_s26   ;;  %p3441_p4 = por %p490_p5, %p61_p13 }
 0x1f7   : > { %p3445_p10 = por %p496_p7, %p67_p1  ;;  %s1810_s28 = sshll.u32 %s729_s24, 3 }
 0x1f8   : > { %s3728_s5 = scalar_select %p3441_p4, 1, 0 }
 0x1f9   : > { %s3729_s6 = scalar_select %p3445_p10, 1, 0 }
 0x1fa   : > { %s1811_s2 = sshll.u32 %s3720_s1, 7  ;;  %s733_s26 = scalar_lea.vmem [#allocation4], %s1810_s28 }
 0x1fb   : > { %s3453_s7 = scalar_lea.hbm %s3730_s0, %s1811_s2  ;;  %s740_s23 = sshll.u32 %s733_s26, 4  ;;  %s3455_s23 = int_to_ptr.vmem [resolvable:$true] %s740_s23 }
 0x1fc   : > { %p3459_p11 = pnand %p2091_p9, %p3428_p3  ;;  %s730_s1 = scalar_lea.sflag [#allocation5], %s729_s24 }
 0x1fd   : > { %s2691_s8 = scalar_lea.hbm %s3453_s7, 128  ;;  %s2696_s17 = scalar_lea.hbm %s3730_s0, 256 }
 0x1fe   : > { %p2692_p12 = scmp.ne.s32.totalorder %s3453_s7, %s2691_s8  ;;  %p2693_p8 = pneg %p3459_p11 }
 0x1ff   : > { %p2697_p1 = scmp.lt.u32.totalorder %s3453_s7, %s3730_s0  ;;  %p2698_p3 = scmp.lt.u32.totalorder %s2696_s17, %s2691_s8 }
 0x200   : > { %p2694_p13 = pnand %p2693_p8, %p2692_p12  ;;  %p2700_p5 = scmp.lt.u32.totalorder %s2691_s8, %s3453_s7 }
 0x201   : > { %p2699_p2 = por %p2698_p3, %p2697_p1 }
 0x202   : > { %p2695_p0 = pneg %p2694_p13 }
 0x203   : > { %p2701_p7 = por %p2700_p5, %p2699_p2 }
 0x205   : > { %p2702_p9 = pnand %p2701_p7, %p2695_p0 }
 0x207   : > { %2705 = shalt.err (!%p2702_p9)
}
 0x208   : > { %s2706_s24 = scalar_lea.vmem %s3455_s23, 128  ;;  %s2847_s26 = smov [#allocation4]  }
 0x209   : > { %p2707_p12 = scmp.ne.s32.totalorder %s3455_s23, %s2706_s24  ;;  %s2711_s28 = sshll.u32 %s2847_s26, 4  ;;  %s2712_s28 = int_to_ptr.vmem [resolvable:$false] %s2711_s28 }
 0x20a   : > { %s2713_s2 = scalar_lea.vmem %s2712_s28, 256  ;;  %p2714_p4 = scmp.lt.s32.totalorder %s3455_s23, %s2712_s28 }
 0x20b   : > { %p2709_p13 = pnand %p2707_p12, %p2693_p8  ;;  %p2715_p1 = scmp.lt.s32.totalorder %s2713_s2, %s2706_s24 }
 0x20d   : > { %p2710_p10 = pneg %p2709_p13  ;;  %p2716_p3 = por %p2715_p1, %p2714_p4 }
 0x20f   : > { %p2717_p2 = pnand %p2716_p3, %p2710_p10 }
 0x211   : > { %2720 = shalt.err (!%p2717_p2)
}
 0x212   : > { %2068 = dma.hbm_to_vmem [thread:$0]  (!%p3459_p11), %s3453_s7, 128, %s3455_s23, %s730_s1  }
 0x213   : > { %s3732_s8 = sld [smem:[#allocation51_spill]] }
 0x219   : > { %p3733_p0 = scmp.ne.s32.totalorder %s3732_s8, 0 }
 0x21a   : > { %s3734_s17 = sld [smem:[#allocation47_spill]] (!%p3733_p0) }
 0x21b   : > { %749 = sbr.rel (%p3733_p0) target bundleno = 2606 (0xa2e), region = 100 }
 0x220   : > { %s3491_s4 = sand.u32 (!%p3733_p0), 1, %s3734_s17  }
 0x221   : > { %s1813_s3 = sshll.u32 (!%p3733_p0), %s3491_s4, 3  ;;  %s752_s24 = scalar_lea.sflag (!%p3733_p0), [#allocation5], %s3491_s4 }
 0x222   : > { %s755_s26 = scalar_lea.vmem [#allocation4], %s1813_s3 }
 0x223   : > { %2766 = dma.done.wait (%p3434_p6), %s752_s24, 128  }
 0x224   : > { %2768 = vsyncadd (%p3434_p6), %s752_s24, 4294967168  ;;  %s3735_s7 = sld [smem:[#allocation50_spill]] }
 0x22a   : > { %p3736_p4 = scmp.eq.s32.totalorder %s3735_s7, 0 }
 0x22c   : > { %2770 = dma.done.wait (%p3736_p4), [#allocation8], 384   ;;  %p3737_p10 = pmov %p3736_p4 }
 0x22d   : > { %p3738_p11 = pmov %p3736_p4 }
 0x22e   : > { %2772 = vsyncadd (%p3737_p10), [#allocation8], 4294966912 }
 0x22f   : > { %2774 = dma.done.wait (%p3738_p11), [#allocation11], 32   ;;  %p3739_p8 = pmov %p3736_p4 }
 0x230   : > { %p3740_p5 = pmov %p3736_p4 }
 0x231   : > { %2776 = vsyncadd (%p3739_p8), [#allocation11], 4294967264 }
 0x232   : > { %2778 = dma.done.wait (%p3740_p5), [#allocation14], 32   ;;  %p3741_p7 = pmov %p3736_p4 }
 0x233   : > { %p3742_p6 = pmov %p3736_p4 }
 0x234   : > { %2780 = vsyncadd (%p3741_p7), [#allocation14], 4294967264 }
 0x235   : > { %2782 = dma.done.wait (%p3742_p6), [#allocation17], 32   ;;  %p3743_p9 = pmov %p3736_p4 }
 0x236   : > { %p3744_p12 = pmov %p3736_p4 }
 0x237   : > { %2784 = vsyncadd (%p3743_p9), [#allocation17], 4294967264 }
 0x238   : > { %2786 = dma.done.wait (%p3744_p12), [#allocation20], 32   ;;  %p3745_p13 = pmov %p3736_p4 }
 0x239   : > { %p3746_p1 = pmov %p3736_p4 }
 0x23a   : > { %2788 = vsyncadd (%p3745_p13), [#allocation20], 4294967264 }
 0x23b   : > { %2790 = dma.done.wait (%p3746_p1), [#allocation23], 144   ;;  %p3747_p3 = pmov %p3746_p1 }
 0x23c   : > { %p3748_p2 = pmov %p3746_p1 }
 0x23d   : > { %2792 = vsyncadd (%p3747_p3), [#allocation23], 4294967152 }
 0x23e   : > { %2794 = dma.done.wait (%p3748_p2), [#allocation26], 256   ;;  %p3749_p0 = pmov %p3746_p1 }
 0x240   : > { %2796 = vsyncadd (%p3749_p0), [#allocation26], 4294967040  ;;  %p3750_p4 = pmov %p3749_p0 }
 0x241   : > { %p3751_p10 = pmov %p3749_p0 }
 0x242   : > { %2798 = dma.done.wait (%p3750_p4), [#allocation29], 144  }
 0x243   : > { %2800 = vsyncadd (%p3751_p10), [#allocation29], 4294967152  ;;  %p3752_p11 = pmov %p3749_p0 }
 0x244   : > { %p3753_p8 = pmov %p3749_p0 }
 0x245   : > { %2802 = dma.done.wait (%p3752_p11), [#allocation32], 400  }
 0x246   : > { %2804 = vsyncadd (%p3753_p8), [#allocation32], 4294966896  ;;  %vm903_vm0 = vcmask 130048   ;;  %v3537_v1 = vld [vmem:[%s755_s26] sm:$0xff]  ;;  %v885_v8 = vld [vmem:[#allocation7] sm:$0xff]  ;;  %vm932_vm1 = vcmask 64512   ;;  %v895_v26 = vlaneseq }
 0x247   : > { %v904_v2 = vsel %vm903_vm0, %v3537_v1, 0.0  ;;  %1887 = vmatprep.mubr.msk.f32.mxu1 %vm932_vm1, %v885_v8  ;;  %v1833_v13 = vld [vmem:[#allocation10] ss:$0 sm:$0xff]  ;;  %v1834_v15 = vld [vmem:[#allocation12] ss:$0 sm:$0xff]  ;;  %v886_v18 = vld [vmem:[#allocation7 + $0x8] sm:$0xff] }
 0x248   : > { %905 = vadd.xlane.f32.xlu0 %v904_v2  ;;  %v2848_v19 = vmov 0.0   ;;  %v3551_v27 = vshrl.u32 %v895_v26, 7  ;;  %v898_v28 = vand.u32 127, %v895_v26  ;;  %v2849_v48 = vmov 0   ;;  %v1837_v52 = vld [vmem:[#allocation3] ss:$0 sm:$0xff] }
 0x249   : > { %1897 = vmatprep.subr.bf16.mxu0 %v2848_v19  ;;  %2169 = vset.pattern.permute.xlu0 %v2849_v48  ;;  %v2850_v55 = vmov 0.0|0.0   ;;  %vm2851_vm10 = vmmov 0   ;;  %v1839_v56 = vld [vmem:[#allocation16] ss:$0 sm:$0xff]  ;;  %v1841_v57 = vld [vmem:[#allocation18] ss:$0 sm:$0xff] }
 0x24a   : > { %vm899_vm2 = vcmp.eq.s32.totalorder %v3551_v27, %v898_v28  ;;  %vm900_vm3 = vcmp.lt.s32.totalorder %v3551_v27, 5  ;;  %vm901_vm6 = vcmp.lt.s32.totalorder %v898_v28, 5  ;;  %1899 = vmatprep.mubr.msk.bf16.mxu0 %vm2851_vm10, %v2848_v19  ;;  %v1840_v58 = vld [vmem:[#allocation13] ss:$0 sm:$0xff]  ;;  %v1842_v59 = vld [vmem:[#allocation15] ss:$0 sm:$0xff] }
 0x24b   : > { %vm1215_vm13 = vcmask 1040384   ;;  %vm1220_vm14 = vcmask 1046528   ;;  %vm1488_vm15 = vcmask 392192   ;;  %s1864_s21 = sshll.u32 %s3735_s7, 7  ;;  %s883_s23 = scalar_lea.vmem [#allocation34], %s1813_s3 }
 0x24c   : > { %s1548_s29 = sshll.u32 %s883_s23, 4  ;;  %s3754_s2 = sld [smem:[#allocation63_spill]]  ;;  %s3600_s29 = int_to_ptr.vmem [resolvable:$true] %s1548_s29 }
 0x24d   : > { %s1535_s3 = scalar_lea.sflag [#allocation6], %s3491_s4  ;;  %s2721_s24 = scalar_lea.vmem %s3600_s29, 128 }
 0x24e   : > { %p2722_p5 = scmp.ne.s32.totalorder %s3600_s29, %s2721_s24  ;;  %p3756_p7 = scmp.ne.s32.totalorder %s3728_s5, 0 }
 0x24f   : > { %s2852_s26 = smov [#allocation34]  }
 0x250   : > { %p2723_p6 = pnand %p2722_p5, %p3756_p7  ;;  %s2725_s7 = sshll.u32 %s2852_s26, 4  ;;  %s2726_s7 = int_to_ptr.vmem [resolvable:$false] %s2725_s7 }
 0x251   : > { %s2727_s0 = scalar_lea.vmem %s2726_s7, 256  ;;  %p2728_p12 = scmp.lt.s32.totalorder %s3600_s29, %s2726_s7 }
 0x252   : > { %s3755_s8 = smov %s3754_s2  ;;  %s3598_s17 = scalar_lea.hbm %s3754_s2, %s1864_s21 }
 0x253   : > { %p2724_p9 = pneg %p2723_p6  ;;  %p2729_p13 = scmp.lt.s32.totalorder %s2727_s0, %s2721_s24 }
 0x255   : > { %p2730_p1 = por %p2729_p13, %p2728_p12 }
 0x257   : > { %p2731_p3 = pnand %p2730_p1, %p2724_p9 }
 0x2d5   : > { %v906_v3 = vpop.xlane.xlu0 %905 }
 0x2d6   : > { %v908_v4 = vmul.f32 0.0625, %v906_v3 }
 0x2d8   : > { %v909_v5 = vsub.f32 %v3537_v1, %v908_v4 }
 0x2da   : > { %v910_v6 = vmul.f32 %v909_v5, %v909_v5 }
 0x2dc   : > { %v911_v7 = vsel %vm903_vm0, %v910_v6, 0.0 }
 0x2dd   : > { %912 = vadd.xlane.f32.xlu0 %v911_v7 }
 0x36a   : > { %v913_v9 = vpop.xlane.xlu0 %912 }
 0x36b   : > { %v914_v10 = vmul.f32 0.0625, %v913_v9  ;;  %v887_v9 = vld [vmem:[#allocation9] sm:$0xff] }
 0x36d   : > { %v915_v11 = vadd.f32 1e-05, %v914_v10 }
 0x36f   : > { %2177 = vrsqrt.f32 %v915_v11 }
 0x379   : > { %v2178_v12 = vpop.eup %2177 }
 0x37a   : > { %v917_v14 = vmul.f32 %v2178_v12, %v909_v5 }
 0x37c   : > { %v924_v16 = vmul.f32 %v1833_v13, %v917_v14 }
 0x37e   : > { %v931_v17 = vadd.f32 %v1834_v15, %v924_v16 }
 0x380   : > { %1885 = vmatprep.subr.mxu1 %v931_v17 }
 0x381   : > { %1886 = vmatpush3.msra.mxu1 %v931_v17 }
 0x382   : > { %1888 = vmatmul.mubr.msk.f32.vlgmr.msra.gmra.mrb[0].mxu1 %vm932_vm1, %v886_v18  ;;  %1931 = vmatprep.subr.bf16.mxu1 %v2850_v55 }
 0x383   : > { %1894 = vmatprep.mubr.msk.f32.mxu1 %vm2851_vm10, %v2848_v19 }
 0x455   : > { %v3546_v20 = vpop.f32.mrb[0].mxu1 }
 0x456   : > { %v1015_v21 = vmul.f32 %v3546_v20, %v3546_v20  ;;  %v1005_v22 = vpop.f32.mrb[1].mxu1 }
 0x457   : > { %v1014_v23 = vmul.f32 %v1005_v22, %v1005_v22 }
 0x459   : > { %v1016_v24 = vadd.f32 %v1015_v21, %v1014_v23  ;;  %v2171_v21 = vld [vmem:[#allocation27] sm:$0xff]  }
 0x45b   : > { %v1017_v25 = vsel %vm903_vm0, %v1016_v24, 0.0 }
 0x45c   : > { %1018 = vadd.xlane.f32.xlu1 %v1017_v25 }
 0x4e9   : > { %v1019_v29 = vpop.xlane.xlu1 %1018 }
 0x4ea   : > { %v1020_v30 = vsel %vm899_vm2, %v1019_v29, 0.0 }
 0x4eb   : > { %v1021_v31 = vsel %vm932_vm1, %v1020_v30, 0.0 }
 0x4ec   : > { %v1022_v32 = vrot.slane %v1021_v31, 4 }
 0x4ee   : > { %v1023_v33 = vadd.f32 %v1022_v32, %v1021_v31  ;;  %v1844_v31 = vld [vmem:[#allocation19] ss:$0 sm:$0xff] }
 0x4f0   : > { %v1024_v34 = vrot.slane %v1023_v33, 2 }
 0x4f2   : > { %v1025_v35 = vadd.f32 %v1024_v34, %v1023_v33  ;;  %v1845_v34 = vld [vmem:[#allocation21] ss:$0 sm:$0xff] }
 0x4f4   : > { %v1026_v36 = vrot.slane %v1025_v35, 1 }
 0x4f6   : > { %v1027_v37 = vadd.f32 %v1026_v36, %v1025_v35 }
 0x4f8   : > { %vm1028_vm4 = vcmp.le.f32.partialorder %v1019_v29, %v1027_v37 }
 0x4f9   : > { %vm1029_vm5 = vmand %vm900_vm3, %vm1028_vm4 }
 0x4fa   : > { %v1030_v38 = vsel %vm1029_vm5, 1.0, %v2848_v19 }
 0x4fb   : > { %v1031_v39 = vsel %vm932_vm1, %v1030_v38, 0.0  ;;  %v2173_v38 = vld [vmem:[#allocation28] sm:$0xff]  }
 0x4fc   : > { %v1032_v40 = vrot.slane %v1031_v39, 4 }
 0x4fe   : > { %v1033_v41 = vadd.f32 %v1032_v40, %v1031_v39 }
 0x500   : > { %v1034_v42 = vrot.slane %v1033_v41, 2 }
 0x502   : > { %v1035_v43 = vadd.f32 %v1034_v42, %v1033_v41 }
 0x504   : > { %v1036_v44 = vrot.slane %v1035_v43, 1 }
 0x506   : > { %v1037_v45 = vadd.f32 %v1036_v44, %v1035_v43 }
 0x508   : > { %vm1038_vm7 = vcmp.ge.f32.partialorder %v1037_v45, 3.0 }
 0x509   : > { %vm1039_vm8 = vmand %vm901_vm6, %vm1038_vm7 }
 0x50a   : > { %v1040_v46 = vsel %vm1039_vm8, %v1027_v37, inf  ;;  %v2172_v37 = vld [vmem:[#allocation25] sm:$0xff]  }
 0x50b   : > { %v1041_v47 = vsel %vm932_vm1, %v1040_v46, inf }
 0x50c   : > { %1042 = vmin.xlane.f32.xlu1 %v1041_v47 }
 0x599   : > { %v1043_v49 = vpop.xlane.xlu1 %1042 }
 0x59a   : > { %v1044_v50 = vadd.f32 1e-06, %v1043_v49  ;;  %v2174_v49 = vld [vmem:[#allocation31] sm:$0xff]  }
 0x59c   : > { %2179 = vrcp.f32 %v1044_v50  ;;  %v2175_v50 = vld [vmem:[#allocation31 + $0x8] sm:$0xff]  }
 0x5a6   : > { %v2180_v51 = vpop.eup %2179 }
 0x5a7   : > { %v1046_v53 = vmul.f32 %v2180_v51, %v1019_v29  ;;  %v2176_v51 = vld [vmem:[#allocation31 + $0x10] sm:$0xff]  }
 0x5a9   : > { %vm1053_vm9 = vcmp.gt.f32.partialorder %v1046_v53, %v1837_v52  ;;  %v1848_v52 = vld [vmem:[#allocation24] ss:$0 sm:$0xff] }
 0x5aa   : > { %v1838_v54 = vsel %vm1053_vm9, 1.0, %v2848_v19 }
 0x5ab   : > { %1058 = vperm.xlu0 %2169, %v1838_v54  }
 0x62a   : > { %v1059_v60 = vpop.permute.xlu0 %1058 }
 0x62b   : > { %v1067_v61 = vmul.f32 %v1839_v56, %v1059_v60  ;;  %v1081_v62 = vmul.f32 %v1841_v57, %v1059_v60 }
 0x62d   : > { %v1074_v63 = vadd.f32 %v1840_v58, %v1067_v61  ;;  %v1088_v0 = vadd.f32 %v1842_v59, %v1081_v62 }
 0x62f   : > { %v1089_v2 = vmul.f32 %v1074_v63, %v1005_v22  ;;  %v1090_v3 = vmul.f32 %v3546_v20, %v1088_v0  ;;  %v1092_v4 = vmul.f32 %v1088_v0, %v1005_v22  ;;  %v1093_v5 = vmul.f32 %v3546_v20, %v1074_v63  ;;  %v2170_v20 = vld [vmem:[#allocation22] sm:$0xff]  }
 0x630   : > { %1898 = vmatpush3.bf16.msra.mxu0 %v2170_v20  ;;  %v1200_v22 = vcvt.s32.f32 %v3551_v27 }
 0x631   : > { %v1091_v6 = vsub.f32 %v1089_v2, %v1090_v3  ;;  %v1094_v7 = vadd.f32 %v1093_v5, %v1092_v4  ;;  %1909 = vmatprep.subr.bf16.mxu0 %v2848_v19 }
 0x632   : > { %v1202_v26 = vmul.f32 0.125, %v1200_v22 }
 0x633   : > { %v1932_v8 = vpack.c.bf16 %v1094_v7, %v1091_v6 }
 0x634   : > { %v1203_v28 = vfloor.f32 %v1202_v26 }
 0x635   : > { %1933 = vmatpush3.bf16.msra.mxu1 %v1932_v8 }
 0x636   : > { %1903 = vmatprep.subr.bf16.mxu1 %v2848_v19  ;;  %v1204_v29 = vmul.f32 8.0, %v1203_v28 }
 0x638   : > { %1895 = vmatmul.mubr.msk.f32.vlgmr.msra.gmra.mrb[2].mxu1 %vm903_vm0, %v887_v9  ;;  %v1205_v32 = vsub.f32 %v1200_v22, %v1204_v29 }
 0x639   : > { %1905 = vmatprep.mubr.msk.bf16.mxu1 %vm2851_vm10, %v2848_v19  ;;  %1904 = vmatpush3.bf16.msra.mxu1 %v2171_v21 }
 0x63a   : > { %1915 = vmatprep.subr.bf16.mxu1 %v2848_v19  ;;  %vm1206_vm11 = vcmp.ge.f32.partialorder %v1205_v32, 0.5  ;;  %vm1209_vm12 = vcmp.le.f32.partialorder %v1205_v32, 6.5 }
 0x63b   : > { %v1846_v41 = vsel %vm1206_vm11, 1.0, %v2848_v19  ;;  %v1847_v42 = vsel %vm1209_vm12, 1.0, %v2848_v19 }
 0x70b   : > { %v1164_v10 = vpop.f32.mrb[2].mxu1 }
 0x70c   : > { %1168 = vst.msk [vmem:[#allocation2] sm:$0xff] %vm903_vm0, %v1164_v10  ;;  %v1896_v11 = vpop.f32.mrb[3].mxu1 }
 0x713   : > { %v1170_v12 = vld [vmem:[#allocation2] sm:$0xff] }
 0x714   : > { %v1173_v13 = vsel %vm903_vm0, %v1170_v12, 0.0 }
 0x715   : > { %1174 = vadd.xlane.f32.xlu1 %v1173_v13 }
 0x7a2   : > { %v1175_v14 = vpop.xlane.xlu1 %1174 }
 0x7a3   : > { %v1176_v15 = vmul.f32 0.0625, %v1175_v14 }
 0x7a5   : > { %v1177_v16 = vsub.f32 %v1170_v12, %v1176_v15 }
 0x7a7   : > { %v1178_v17 = vmul.f32 %v1177_v16, %v1177_v16 }
 0x7a9   : > { %v1179_v18 = vsel %vm903_vm0, %v1178_v17, 0.0 }
 0x7aa   : > { %1180 = vadd.xlane.f32.xlu1 %v1179_v18 }
 0x837   : > { %v1181_v23 = vpop.xlane.xlu1 %1180 }
 0x838   : > { %v1182_v24 = vmul.f32 0.0625, %v1181_v23 }
 0x83a   : > { %v1183_v25 = vadd.f32 1e-05, %v1182_v24 }
 0x83c   : > { %2181 = vrsqrt.f32 %v1183_v25  ;;  %v1858_v25 = vld [vmem:[#allocation33] ss:$0 sm:$0xff] }
 0x846   : > { %v2182_v30 = vpop.eup %2181 }
 0x847   : > { %v1185_v33 = vmul.f32 %v2182_v30, %v1177_v16 }
 0x849   : > { %v1192_v35 = vmul.f32 %v1844_v31, %v1185_v33 }
 0x84b   : > { %v1199_v36 = vadd.f32 %v1845_v34, %v1192_v35 }
 0x84d   : > { %v1223_v27 = vpack.c.bf16 %v1199_v36, %v1199_v36  ;;  %v1213_v39 = vrot.slane %v1199_v36, 7  ;;  %v1218_v40 = vrot.slane %v1199_v36, 1 }
 0x84f   : > { %1900 = vmatmul.mubr.msk.bf16.vlgmr.msra.gmra.mrb[0].mxu0 %vm903_vm0, %v1223_v27  ;;  %1906 = vmatmul.mubr.msk.bf16.vlgmr.msra.gmra.mrb[4].mxu1 %vm903_vm0, %v1223_v27  ;;  %v1216_v43 = vsel %vm1215_vm13, 0.0, %v1213_v39  ;;  %v1221_v44 = vsel %vm1220_vm14, %v1218_v40, 0.0 }
 0x850   : > { %1910 = vmatpush3.bf16.msra.mxu0 %v2172_v37  ;;  %1916 = vmatpush3.bf16.msra.mxu1 %v2173_v38  ;;  %v1217_v45 = vmul.f32 %v1846_v41, %v1216_v43  ;;  %v1222_v46 = vmul.f32 %v1847_v42, %v1221_v44 }
 0x851   : > { %1911 = vmatprep.mubr.msk.bf16.mxu0 %vm2851_vm10, %v2848_v19  ;;  %1917 = vmatprep.mubr.msk.bf16.mxu1 %vm2851_vm10, %v2848_v19 }
 0x852   : > { %1921 = vmatprep.subr.bf16.mxu0 %v2848_v19  ;;  %v1282_v47 = vpack.c.bf16 %v1217_v45, %v1217_v45  ;;  %v1382_v48 = vpack.c.bf16 %v1222_v46, %v1222_v46 }
 0x857   : > { %1912 = vmatmul.mubr.msk.bf16.vlgmr.msra.gmra.mrb[4].mxu0 %vm903_vm0, %v1282_v47  ;;  %1918 = vmatmul.mubr.msk.bf16.vlgmr.msra.gmra.mrb[8].mxu1 %vm903_vm0, %v1382_v48 }
 0x858   : > { %1927 = vmatprep.mubr.msk.bf16.mxu0 %vm2851_vm10, %v2848_v19  ;;  %1922 = vmatpush3.bf16.msra.mxu0 %v2174_v49 }
 0x859   : > { %1923 = vmatprep.subr.bf16.mxu0 %v2848_v19 }
 0x85c   : > { %1924 = vmatpush3.bf16.msra.mxu0 %v2175_v50 }
 0x85d   : > { %1925 = vmatprep.subr.bf16.mxu0 %v2848_v19  ;;  %v1857_v19 = vld [vmem:[#allocation30] ss:$0 sm:$0xff] }
 0x860   : > { %1926 = vmatpush3.bf16.msra.mxu0 %v2176_v51 }
 0x922   : > { %v1276_v53 = vpop.f32.mrb[0].mxu0  ;;  %v1327_v54 = vpop.f32.mrb[4].mxu1 }
 0x923   : > { %v1277_v55 = vadd.f32 %v1848_v52, %v1276_v53  ;;  %v1901_v56 = vpop.f32.mrb[1].mxu0  ;;  %v1907_v57 = vpop.f32.mrb[5].mxu1 }
 0x924   : > { %v1279_v58 = vpop.f32.mrb[2].mxu0  ;;  %v1330_v59 = vpop.f32.mrb[6].mxu1 }
 0x925   : > { %v1444_v60 = vmul.f32 0.70710677, %v1277_v55  ;;  %v1902_v61 = vpop.f32.mrb[3].mxu0  ;;  %v1908_v62 = vpop.f32.mrb[7].mxu1  ;;  %v1443_v13 = vmul.f32 0.5, %v1277_v55 }
 0x927   : > { %2183 = verf.f32 %v1444_v60 }
 0x92a   : > { %v1376_v63 = vpop.f32.mrb[4].mxu0  ;;  %v1428_v0 = vpop.f32.mrb[8].mxu1 }
 0x92b   : > { %v1377_v2 = vadd.f32 %v1376_v63, %v1327_v54  ;;  %v1913_v3 = vpop.f32.mrb[5].mxu0  ;;  %v1919_v4 = vpop.f32.mrb[9].mxu1 }
 0x92c   : > { %v1379_v5 = vpop.f32.mrb[6].mxu0  ;;  %v1431_v6 = vpop.f32.mrb[10].mxu1 }
 0x92d   : > { %v1434_v7 = vadd.f32 %v1428_v0, %v1377_v2  ;;  %v1914_v8 = vpop.f32.mrb[7].mxu0  ;;  %v1920_v9 = vpop.f32.mrb[11].mxu1 }
 0x92f   : > { %v1442_v10 = vadd.f32 %v1857_v19, %v1434_v7 }
 0x931   : > { %v2184_v11 = vpop.eup %2183  ;;  %v1449_v12 = vmul.f32 0.70710677, %v1442_v10  ;;  %v1448_v18 = vmul.f32 0.5, %v1442_v10 }
 0x932   : > { %v1446_v14 = vadd.f32 1.0, %v2184_v11 }
 0x933   : > { %2185 = verf.f32 %v1449_v12 }
 0x934   : > { %v1447_v15 = vmul.f32 %v1446_v14, %v1443_v13 }
 0x936   : > { %v1454_v16 = vmul.f32 %v1447_v15, %v1442_v10 }
 0x93d   : > { %v2186_v17 = vpop.eup %2185 }
 0x93e   : > { %v1451_v20 = vadd.f32 1.0, %v2186_v17 }
 0x940   : > { %v1452_v21 = vmul.f32 %v1451_v20, %v1448_v18 }
 0x942   : > { %v1453_v22 = vmul.f32 %v1452_v21, %v1277_v55 }
 0x944   : > { %v1455_v23 = vadd.f32 %v1454_v16, %v1453_v22 }
 0x946   : > { %v1456_v24 = vpack.c.bf16 %v1455_v23, %v1455_v23 }
 0x948   : > { %1928 = vmatmul.mubr.msk.bf16.vlgmr.msra.gmra.mrb[8].mxu0 %vm1488_vm15, %v1456_v24 }
 0xa1b   : > { %v1526_v26 = vpop.f32.mrb[8].mxu0 }
 0xa1c   : > { %v1527_v28 = vadd.f32 %v1858_v25, %v1526_v26  ;;  %v1929_v29 = vpop.f32.mrb[9].mxu0 }
 0xa1d   : > { %v1529_v30 = vpop.f32.mrb[10].mxu0 }
 0xa1e   : > { %v1532_v31 = vadd.f32 %v1527_v28, %v3537_v1  ;;  %v1930_v32 = vpop.f32.mrb[11].mxu0 }
 0xa20   : > { %1533 = vst.msk [vmem:[%s883_s23] sm:$0xff] %vm903_vm0, %v1532_v31 }
 0xa21   : > { %2734 = shalt.err (!%p2731_p3)
}
 0xa22   : > { %s2735_s4 = scalar_lea.hbm %s3598_s17, 128  ;;  %s2739_s1 = scalar_lea.hbm %s3755_s8, 256 }
 0xa23   : > { %p2736_p2 = scmp.ne.s32.totalorder %s3598_s17, %s2735_s4  ;;  %p2740_p10 = scmp.lt.u32.totalorder %s3598_s17, %s3755_s8 }
 0xa24   : > { %p2741_p11 = scmp.lt.u32.totalorder %s2739_s1, %s2735_s4  ;;  %p2743_p5 = scmp.lt.u32.totalorder %s2735_s4, %s3598_s17 }
 0xa25   : > { %p2737_p0 = pnand %p2736_p2, %p3756_p7 }
 0xa26   : > { %p2742_p8 = por %p2741_p11, %p2740_p10 }
 0xa27   : > { %p2738_p4 = pneg %p2737_p0 }
 0xa28   : > { %p2744_p6 = por %p2743_p5, %p2742_p8 }
 0xa2a   : > { %p2745_p9 = pnand %p2744_p6, %p2738_p4 }
 0xa2c   : > { %2748 = shalt.err (!%p2745_p9)
}
 0xa2d   : > { %2008 = dma.vmem_to_hbm [thread:$0]  (%p3756_p7), %s3600_s29, 128, %s3598_s17, %s1535_s3  }
 0xa2e PF: > { %s3757_s0 = sld [smem:[#allocation46_spill]]  ;;  %s3758_s24 = sld [smem:[#allocation49_spill]] }
 0xa2f   : > { %p3759_p12 = scmp.ne.s32.totalorder %s3729_s6, 0 }
 0xa34   : > { %s1560_s26 = sand.u32 1, %s3757_s0   ;;  %p3760_p13 = scmp.ge.s32.totalorder %s3758_s24, 2 }
 0xa35   : > { %s1561_s7 = scalar_lea.sflag [#allocation6], %s1560_s26 }
 0xa36   : > { %p2070_p1 = pnand %p3760_p13, %p3759_p12 }
 0xa38   : > { %2806 = dma.done.wait (!%p2070_p1), %s1561_s7, 128  }
 0xa39   : > { %2808 = vsyncadd (!%p2070_p1), %s1561_s7, 4294967168  ;;  %s3761_s23 = sld [smem:[#allocation47_spill]]  ;;  %s3762_s24 = sld [smem:[#allocation48_spill]] }
 0xa3a   : > { %p44_p3 = scmp.ge.s32.totalorder %s3415_s9, 4   ;;  %s3763_s2 = smov %s3426_s25 }
 0xa3c   :  { %46 = sbr.rel (!%p44_p3) target bundleno = 27 (0x1b), region = 217 }
 0xa43   :  { %1566 = vsyncpa [#allocation5], 1 }
 0xa44   :  { %1568 = vsyncpa [#allocation5 + $0x1], 1 }
 0xa45   :  { %1569 = vsyncpa [#allocation8], 1 }
 0xa46   :  { %1570 = vsyncpa [#allocation11], 1 }
 0xa47   :  { %1571 = vsyncpa [#allocation14], 1 }
 0xa48   :  { %1572 = vsyncpa [#allocation17], 1 }
 0xa49   :  { %1573 = vsyncpa [#allocation20], 1 }
 0xa4a   :  { %1574 = vsyncpa [#allocation23], 1 }
 0xa4b   :  { %1575 = vsyncpa [#allocation26], 1 }
 0xa4c   :  { %1576 = vsyncpa [#allocation29], 1 }
 0xa4d   :  { %1577 = vsyncpa [#allocation32], 1 }
 0xa4e   :  { %1578 = vsyncpa [#allocation6], 1 }
 0xa4f   :  { %1580 = vsyncpa [#allocation6 + $0x1], 1 }

</bundles_post_ra>
